<compile_context>
chip_gen: v6e
topology: v6e:2x2x1
jax: 0.10.0
libtpu: 0.0.40
codegen_flags: <defaults>
</compile_context>

<pallas_src>
import functools
import math

import jax
import jax.numpy as jnp
from jax import lax
from jax.experimental import pallas as pl
from jax.experimental.pallas import tpu as pltpu


def _round_up(x, m):
    return (x + m - 1) // m * m


def _fourier_kernel(t_ref, expand_ref, freq_ref, phase_ref, o_ref, *, std):
    # t_ref:      (TR, G)   G timesteps feed each L-lane output row
    # expand_ref: (G, L)    0/1 matrix, expand[j, l] = (l // 2B == j)
    # freq_ref:   (1, L)    freqs[(l % 2B) % B]
    # phase_ref:  (1, L)    0.0 on sin lanes, pi/2 on cos lanes
    # o_ref:      (TR, L)   row-major view of the (N, 2B) output
    g = t_ref.shape[-1]
    if g == 1:
        # 2B is a multiple of 128: pure lane/sublane broadcast, no MXU needed.
        steps = t_ref[...] * freq_ref[...]
    else:
        # Exact lane expansion t_exp[r, l] = t[r, l // 2B] via a 0/1 matmul on
        # the otherwise idle MXU; HIGHEST keeps the f32 values bit-exact.
        t_exp = jnp.dot(t_ref[...], expand_ref[...],
                        precision=lax.Precision.HIGHEST,
                        preferred_element_type=jnp.float32)
        steps = t_exp * freq_ref[...]                 # exact f32 VPU multiply
    # cos(x) = sin(x + pi/2): a single EUP op per element, no select on VPU.
    o_ref[...] = (jnp.sin(steps + phase_ref[...]) * std).astype(o_ref.dtype)


def fourier_features(t, *, max_freq, num_bands, std=1.0):
    """Pallas TPU implementation of FourierFeatures.forward.

    Args:
      t: 1-D float array of shape [N] (timesteps).
    Returns:
      [N, 2*num_bands] float32 embedding = [sin(t*f), cos(t*f)] * std.
    """
    t = t.astype(jnp.float32)
    n = t.shape[0]
    two_b = 2 * num_bands
    # L lanes per output row: smallest multiple of 128 holding whole
    # (sin|cos) groups -> every output store is a full-width unmasked vst.
    L = two_b * 128 // math.gcd(two_b, 128)
    G = L // two_b                                   # timesteps per output row

    # Parameter-free module: freqs derived deterministically, matching
    # torch.exp2(torch.linspace(0, max_freq, num_bands)).
    freqs = jnp.exp2(jnp.linspace(0.0, float(max_freq), num_bands,
                                  dtype=jnp.float32))

    rows = -(-n // G)                                # ceil(n / G)
    n_grp = rows * G
    t_pad = jnp.pad(t, (0, n_grp - n)) if n_grp != n else t
    t_g = t_pad.reshape(rows, G)                     # free row-major reshape

    # Grid-invariant lane tables (index_map -> (0, 0); fetched once).
    lane = jnp.arange(L, dtype=jnp.int32)
    chan = lane % two_b
    expand01 = (lane[None, :] // two_b
                == jnp.arange(G, dtype=jnp.int32)[:, None]).astype(jnp.float32)
    freq_lane = freqs[chan % num_bands].reshape(1, L)
    phase_lane = jnp.where(chan < num_bands,
                           jnp.float32(0.0),
                           jnp.float32(math.pi / 2.0)).reshape(1, L)

    # Tile rows by bytes: ~16 MiB of double-buffered pipeline buffers.  The
    # (TR, G) t block lane-pads to 128 lanes in VMEM, so it costs the same as
    # a 128-lane output block, not TR*G*4.  The explicit 32 MiB scoped-VMEM
    # limit leaves headroom for Mosaic temporaries and fits every generation.
    PIPE_BUDGET = 16 << 20
    VMEM_LIMIT = 32 << 20
    table_bytes = 2 * 4 * (_round_up(G, 8) * L + 2 * 8 * L)
    per_row_bytes = 4 * (_round_up(G, 128) + L)
    budget = max(PIPE_BUDGET - table_bytes, 2 * 8 * per_row_bytes)
    tile_rows = max(8, budget // (2 * per_row_bytes) // 8 * 8)
    tile_rows = min(tile_rows, _round_up(rows, 8))

    grid = (pl.cdiv(rows, tile_rows),)               # partial tail block OK

    kernel = functools.partial(_fourier_kernel, std=float(std))
    cost = pl.CostEstimate(
        flops=int(rows * L * (2 * G + 3)),
        transcendentals=int(rows * L),               # single sin per element
        bytes_accessed=int(4 * (rows * G + rows * L + G * L + 2 * L)),
    )

    out_view = pl.pallas_call(
        kernel,
        out_shape=jax.ShapeDtypeStruct((rows, L), jnp.float32),
        grid=grid,
        in_specs=[
            pl.BlockSpec((tile_rows, G), lambda i: (i, 0)),
            pl.BlockSpec((G, L), lambda i: (0, 0)),   # grid-invariant
            pl.BlockSpec((1, L), lambda i: (0, 0)),   # grid-invariant
            pl.BlockSpec((1, L), lambda i: (0, 0)),   # grid-invariant
        ],
        out_specs=pl.BlockSpec((tile_rows, L), lambda i: (i, 0)),
        # TODO(synk): on v7x, confirm in the profile that the row axis really
        # shards across both TensorCores; if one core is idle, switch this
        # axis to pltpu.CORE_PARALLEL (or split explicitly via core_map).
        # TODO(synk): if writeback is exposed after these changes, sweep
        # pipeline_mode=pl.Buffered(3) on out_specs.
        compiler_params=pltpu.CompilerParams(
            dimension_semantics=("parallel",),
            vmem_limit_bytes=VMEM_LIMIT),
        cost_estimate=cost,
    )(t_g, expand01, freq_lane, phase_lane)

    out = out_view.reshape(n_grp, two_b)             # free row-major reshape
    return out[:n] if n_grp != n else out            # only copies for ragged N


def _reference(t, *, max_freq, num_bands, std=1.0):
    freqs = jnp.exp2(jnp.linspace(0.0, float(max_freq), num_bands,
                                  dtype=jnp.float32))
    steps = t[:, None].astype(jnp.float32) * freqs[None]
    return jnp.concatenate((jnp.sin(steps), jnp.cos(steps)), axis=-1) * std


if __name__ == "__main__":
    key = jax.random.PRNGKey(0)
    k0, k1, k2, k3 = jax.random.split(key, 4)

    # Tolerance note: cos lanes are computed as sin(steps + pi/2); the f32
    # rounding of the added phase contributes at most ~0.5*ulp(steps) absolute
    # error (~1.5e-5 at |steps| ~ 256), hence atol=3e-5.  Sin lanes are exact.
    def _check(out, ref, name):
        assert out.shape == ref.shape, (name, out.shape, ref.shape)
        assert jnp.allclose(out, ref, atol=3e-5, rtol=1e-5), name

    # 1) 2*num_bands divides 128 (2B=32 -> L=128, G=4).
    mf, nb, std = 8.0, 16, 0.5
    t1 = jax.random.uniform(k0, (256,), dtype=jnp.float32)
    out1 = jax.block_until_ready(
        fourier_features(t1, max_freq=mf, num_bands=nb, std=std))
    _check(out1, _reference(t1, max_freq=mf, num_bands=nb, std=std),
           "lane-dense mismatch")

    # 2) Ragged N (exercises t padding + final slice).
    t2 = jax.random.uniform(k1, (50,), dtype=jnp.float32)
    out2 = jax.block_until_ready(
        fourier_features(t2, max_freq=mf, num_bands=nb, std=1.0))
    _check(out2, _reference(t2, max_freq=mf, num_bands=nb, std=1.0),
           "ragged-N mismatch")

    # 3) 2*num_bands does not divide 128 (2B=24 -> L=384, G=16): still
    #    lane-dense stores via the generalized (rows, L) view.
    t3 = jax.random.uniform(k2, (36,), dtype=jnp.float32)
    out3 = jax.block_until_ready(
        fourier_features(t3, max_freq=4.0, num_bands=12, std=1.0))
    _check(out3, _reference(t3, max_freq=4.0, num_bands=12, std=1.0),
           "L=384 mismatch")

    # 4) 2*num_bands is a multiple of 128 (2B=256 -> L=256, G=1, no MXU).
    t4 = jax.random.uniform(k3, (40,), dtype=jnp.float32)
    out4 = jax.block_until_ready(
        fourier_features(t4, max_freq=6.0, num_bands=128, std=0.25))
    _check(out4, _reference(t4, max_freq=6.0, num_bands=128, std=0.25),
           "G=1 mismatch")

    print("KERNEL_OK")
</pallas_src>

<mosaic_0001>
module attributes {stable_mosaic.version = 11 : i64} {
  func.func @_fourier_kernel(%arg0: i32, %arg1: memref<64x4xf32, #tpu.memory_space<vmem>>, %arg2: memref<4x128xf32, #tpu.memory_space<vmem>>, %arg3: memref<1x128xf32, #tpu.memory_space<vmem>>, %arg4: memref<1x128xf32, #tpu.memory_space<vmem>>, %arg5: memref<64x128xf32, #tpu.memory_space<vmem>>) attributes {dimension_semantics = [#tpu.dimension_semantics<parallel>], iteration_bounds = array<i64: 1>, scalar_prefetch = 0 : i64, scratch_operands = 0 : i64, tpu.core_type = #tpu.core_type<tc>, window_params = [{transform_indices = @transform_0, window_bounds = array<i64: 64, 4>}, {pipeline_mode = #tpu.pipeline_mode<synchronous>, transform_indices = @transform_1, window_bounds = array<i64: 4, 128>}, {pipeline_mode = #tpu.pipeline_mode<synchronous>, transform_indices = @transform_2, window_bounds = array<i64: 1, 128>}, {pipeline_mode = #tpu.pipeline_mode<synchronous>, transform_indices = @transform_3, window_bounds = array<i64: 1, 128>}, {transform_indices = @transform_4, window_bounds = array<i64: 64, 128>}]} {
    %c0 = arith.constant 0 : index
    %c0_0 = arith.constant 0 : index
    %0 = vector.load %arg1[%c0, %c0_0] : memref<64x4xf32, #tpu.memory_space<vmem>>, vector<64x4xf32>
    %c0_1 = arith.constant 0 : index
    %c0_2 = arith.constant 0 : index
    %1 = vector.load %arg2[%c0_1, %c0_2] : memref<4x128xf32, #tpu.memory_space<vmem>>, vector<4x128xf32>
    %cst = arith.constant dense<0.000000e+00> : vector<64x128xf32>
    %2 = tpu.matmul %0, %1, %cst {dimension_numbers = #tpu.dot_dimension_numbers<[1], [0], [0], [1], [0, 0, 1, 1], [], []>, precision = #tpu.contract_precision<fp32>} : vector<64x4xf32>, vector<4x128xf32>, vector<64x128xf32> -> vector<64x128xf32>
    %c0_3 = arith.constant 0 : index
    %c0_4 = arith.constant 0 : index
    %3 = vector.load %arg3[%c0_3, %c0_4] : memref<1x128xf32, #tpu.memory_space<vmem>>, vector<1x128xf32>
    %4 = vector.broadcast %3 : vector<1x128xf32> to vector<64x128xf32>
    %5 = arith.mulf %2, %4 : vector<64x128xf32>
    %c0_5 = arith.constant 0 : index
    %c0_6 = arith.constant 0 : index
    %6 = vector.load %arg4[%c0_5, %c0_6] : memref<1x128xf32, #tpu.memory_space<vmem>>, vector<1x128xf32>
    %7 = vector.broadcast %6 : vector<1x128xf32> to vector<64x128xf32>
    %8 = arith.addf %5, %7 : vector<64x128xf32>
    %9 = math.sin %8 : vector<64x128xf32>
    %cst_7 = arith.constant 5.000000e-01 : f32
    %10 = vector.broadcast %cst_7 : f32 to vector<64x128xf32>
    %11 = arith.mulf %9, %10 : vector<64x128xf32>
    %c0_8 = arith.constant 0 : index
    %c0_9 = arith.constant 0 : index
    %12 = vector.load %arg5[%c0_8, %c0_9] : memref<64x128xf32, #tpu.memory_space<vmem>>, vector<64x128xf32>
    tpu.vector_store %arg5[%c0_8, %c0_9], %11 {strides = array<i32>} : memref<64x128xf32, #tpu.memory_space<vmem>>, vector<64x128xf32>,
    return
  }
  func.func @transform_0(%arg0: i32) -> (i32, i32) {
    %c0_i32 = arith.constant 0 : i32
    %c0_i32_0 = arith.constant 0 : i32
    return %arg0, %c0_i32 : i32, i32
  }
  func.func @transform_1(%arg0: i32) -> (i32, i32) {
    %c0_i32 = arith.constant 0 : i32
    %c0_i32_0 = arith.constant 0 : i32
    %c0_i32_1 = arith.constant 0 : i32
    return %c0_i32, %c0_i32_0 : i32, i32
  }
  func.func @transform_2(%arg0: i32) -> (i32, i32) {
    %c0_i32 = arith.constant 0 : i32
    %c0_i32_0 = arith.constant 0 : i32
    %c0_i32_1 = arith.constant 0 : i32
    return %c0_i32, %c0_i32_0 : i32, i32
  }
  func.func @transform_3(%arg0: i32) -> (i32, i32) {
    %c0_i32 = arith.constant 0 : i32
    %c0_i32_0 = arith.constant 0 : i32
    %c0_i32_1 = arith.constant 0 : i32
    return %c0_i32, %c0_i32_0 : i32, i32
  }
  func.func @transform_4(%arg0: i32) -> (i32, i32) {
    %c0_i32 = arith.constant 0 : i32
    %c0_i32_0 = arith.constant 0 : i32
    return %arg0, %c0_i32 : i32, i32
  }
}

</mosaic_0001>

<bundles_post_ra>
// kernel: tpu_custom_call.1
= control target key start
LH: loop header
LB: loop body
LE: loop exit
PB: predicated region body
PF: predicated region fallthrough
CT: control target
= control target key end

     0   :  { %vm52_vm0 = vcmask 1043456   ;;  %vm27_vm1 = vcmask 31744   ;;  %s2740_s0 = inlined_call_operand.vmem [shape: f32[64,4], index: 0, kind: input, shape index: {}]   ;;  %s2741_s1 = inlined_call_operand.vmem [shape: f32[4,128], index: 1, kind: input, shape index: {}]   ;;  %s2742_s2 = inlined_call_operand.vmem [shape: f32[1,128], index: 2, kind: input, shape index: {}]   ;;  %s2743_s3 = inlined_call_operand.vmem [shape: f32[1,128], index: 3, kind: input, shape index: {}]   ;;  %s2744_s4 = inlined_call_operand.hbm [shape: f32[64,128], index: 4, kind: output, shape index: {}]  }
   0x1   :  { %v26_v0 = vld [vmem:[%s2741_s1] sm:$0xf]  ;;  %v19_v2 = vld [vmem:[%s2740_s0 + $0x8] sm:$0xff]  ;;  %v20_v6 = vld [vmem:[%s2740_s0 + $0x10] sm:$0xff] }
   0x2   :  { %v18_v1 = vld [vmem:[%s2740_s0] sm:$0xff]  ;;  %v54_v3 = vsel %vm52_vm0, %v26_v0, 0  ;;  %v32_v5 = vsel %vm27_vm1, %v19_v2, 0  ;;  %v21_v7 = vld [vmem:[%s2740_s0 + $0x18] sm:$0xff]  ;;  %v35_v12 = vsel %vm27_vm1, %v20_v6, 0  ;;  %v23_v13 = vld [vmem:[%s2740_s0 + $0x28] sm:$0xff] }
   0x3   :  { %v29_v4 = vsel %vm27_vm1, %v18_v1, 0  ;;  %v22_v8 = vld [vmem:[%s2740_s0 + $0x20] sm:$0xff]  ;;  %v2020_v9 = vand.u32 4294901760, %v54_v3  ;;  %v2024_v11 = vand.u32 4294901760, %v32_v5  ;;  %v24_v14 = vld [vmem:[%s2740_s0 + $0x30] sm:$0xff]  ;;  %v2033_v15 = vand.u32 4294901760, %v35_v12 }
   0x4   :  { %v2022_v10 = vand.u32 4294901760, %v29_v4  ;;  %v38_v16 = vsel %vm27_vm1, %v21_v7, 0  ;;  %v41_v17 = vsel %vm27_vm1, %v22_v8, 0  ;;  %v44_v18 = vsel %vm27_vm1, %v23_v13, 0 }
   0x5   :  { %1785 = vmatprep.subr.mxu0 %v2020_v9  ;;  %v234_v20 = vsub.f32 %v54_v3, %v2020_v9  ;;  %v2044_v21 = vsub.f32 %v32_v5, %v2024_v11  ;;  %v2047_v22 = vand.u32 4294901760, %v38_v16 }
   0x6   :  { %v2040_v19 = vsub.f32 %v29_v4, %v2022_v10  ;;  %1801 = vmatprep.mubr.f32.mxu1 %v2022_v10 }
   0x7   :  { %9 = vsyncpa [#allocation3], 0  ;;  %1786 = vmatpush3.msra.mxu0 %v2020_v9  ;;  %v2051_v23 = vsub.f32 %v35_v12, %v2033_v15  ;;  %v2053_v24 = vand.u32 4294901760, %v41_v17  ;;  %v2055_v25 = vand.u32 4294901760, %v44_v18  ;;  %v47_v26 = vsel %vm27_vm1, %v24_v14, 0  ;;  %v25_v43 = vld [vmem:[%s2740_s0 + $0x38] sm:$0xff] }
   0x8   :  { %v124_v27 = vand.u32 4294901760, %v2040_v19  ;;  %v235_v28 = vand.u32 4294901760, %v234_v20  ;;  %1813 = vmatprep.subr.mxu0 %v234_v20  ;;  %v134_v29 = vand.u32 4294901760, %v2044_v21  ;;  %v2061_v30 = vsub.f32 %v38_v16, %v2047_v22 }
   0x9   :  { %v144_v31 = vand.u32 4294901760, %v2051_v23  ;;  %v2065_v32 = vsub.f32 %v41_v17, %v2053_v24  ;;  %v2068_v33 = vsub.f32 %v44_v18, %v2055_v25  ;;  %v2070_v34 = vand.u32 4294901760, %v47_v26 }
   0xa   :  { %v125_v35 = vsub.f32 %v2040_v19, %v124_v27  ;;  %v236_v36 = vsub.f32 %v234_v20, %v235_v28  ;;  %v135_v37 = vsub.f32 %v2044_v21, %v134_v29  ;;  %v154_v38 = vand.u32 4294901760, %v2061_v30 }
   0xb   :  { %v145_v39 = vsub.f32 %v2051_v23, %v144_v31  ;;  %v164_v40 = vand.u32 4294901760, %v2065_v32  ;;  %v174_v41 = vand.u32 4294901760, %v2068_v33  ;;  %v183_v42 = vsub.f32 %v47_v26, %v2070_v34 }
   0xc   :  { %v126_v44 = vand.u32 4294901760, %v125_v35  ;;  %v237_v45 = vand.u32 4294901760, %v236_v36  ;;  %v136_v46 = vand.u32 4294901760, %v135_v37  ;;  %v155_v47 = vsub.f32 %v2061_v30, %v154_v38 }
   0xd   :  { %v146_v48 = vand.u32 4294901760, %v145_v39  ;;  %v165_v49 = vsub.f32 %v2065_v32, %v164_v40  ;;  %v184_v50 = vand.u32 4294901760, %v183_v42  ;;  %v50_v51 = vsel %vm27_vm1, %v25_v43, 0 }
   0xe   :  { %1787 = vmatprep.mubr.f32.mxu0 %v126_v44  ;;  %1799 = vmatprep.subr.mxu1 %v237_v45  ;;  %v156_v52 = vand.u32 4294901760, %v155_v47  ;;  %v175_v53 = vsub.f32 %v2068_v33, %v174_v41  ;;  %v192_v54 = vand.u32 4294901760, %v50_v51 }
   0xf   :  { %1788 = vmatmul.mubr.f32.vlgmr.msra.gmra.mxu0 %v136_v46  ;;  %1800 = vmatpush3.msra.mxu1 %v237_v45  ;;  %v166_v55 = vand.u32 4294901760, %v165_v49  ;;  %v185_v56 = vsub.f32 %v183_v42, %v184_v50 }
  0x10   :  { %1814 = vmatpush3.msra.mxu0 %v234_v20  ;;  %1802 = vmatmul.mubr.f32.vlgmr.msra.gmra.mxu1 %v2024_v11  ;;  %v193_v57 = vsub.f32 %v50_v51, %v192_v54  ;;  %v176_v58 = vand.u32 4294901760, %v175_v53 }
  0x11   :  { %1827 = vmatprep.subr.mxu1 %v2020_v9  ;;  %1790 = vmatprep.mubr.f32.mxu0 %v146_v48  ;;  %v186_v60 = vand.u32 4294901760, %v185_v56 }
  0x12   :  { %1828 = vmatpush3.msra.mxu1 %v2020_v9  ;;  %1804 = vmatprep.mubr.f32.mxu1 %v2033_v15  ;;  %v194_v59 = vand.u32 4294901760, %v193_v57 }
  0x13   :  { %1791 = vmatmul.mubr.f32.gmra.mxu0 %v156_v52  ;;  %1841 = vmatprep.subr.mxu0 %v235_v28 }
  0x14   :  { %1805 = vmatmul.mubr.f32.gmra.mxu1 %v2047_v22  ;;  %1793 = vmatprep.mubr.f32.mxu0 %v166_v55  ;;  %v195_v61 = vsub.f32 %v193_v57, %v194_v59 }
  0x15   :  { %1807 = vmatprep.mubr.f32.mxu1 %v2053_v24  ;;  %1855 = vmatprep.subr.mxu1 %v2020_v9 }
  0x16   :  { %v196_v62 = vand.u32 4294901760, %v195_v61 }
  0x17   :  { %1794 = vmatmul.mubr.f32.gmra.mxu0 %v176_v58 }
  0x18   :  { %1808 = vmatmul.mubr.f32.gmra.mxu1 %v2055_v25  ;;  %1796 = vmatprep.mubr.f32.mxu0 %v186_v60 }
  0x19   :  { %1810 = vmatprep.mubr.f32.mxu1 %v2070_v34 }
  0x1b   :  { %1797 = vmatmul.mubr.f32.gmra.mxu0 %v196_v62 }
  0x1c   :  { %1811 = vmatmul.mubr.f32.gmra.mxu1 %v192_v54  ;;  %1815 = vmatprep.mubr.f32.mxu0 %v2040_v19 }
  0x1d   :  { %1829 = vmatprep.mubr.f32.mxu1 %v124_v27 }
  0x1f   :  { %1816 = vmatmul.mubr.f32.vlgmr.msra.gmra.mxu0 %v2044_v21 }
  0x20   :  { %1842 = vmatpush3.msra.mxu0 %v235_v28  ;;  %1830 = vmatmul.mubr.f32.vlgmr.msra.gmra.mxu1 %v134_v29 }
  0x21   :  { %1856 = vmatpush3.msra.mxu1 %v2020_v9  ;;  %1818 = vmatprep.mubr.f32.mxu0 %v2051_v23 }
  0x22   :  { %1832 = vmatprep.mubr.f32.mxu1 %v144_v31 }
  0x23   :  { %1819 = vmatmul.mubr.f32.gmra.mxu0 %v2061_v30 }
  0x24   :  { %1833 = vmatmul.mubr.f32.gmra.mxu1 %v154_v38  ;;  %1821 = vmatprep.mubr.f32.mxu0 %v2065_v32 }
  0x25   :  { %1835 = vmatprep.mubr.f32.mxu1 %v164_v40 }
  0x27   :  { %1822 = vmatmul.mubr.f32.gmra.mxu0 %v2068_v33 }
  0x28   :  { %1836 = vmatmul.mubr.f32.gmra.mxu1 %v174_v41  ;;  %1824 = vmatprep.mubr.f32.mxu0 %v183_v42 }
  0x29   :  { %1838 = vmatprep.mubr.f32.mxu1 %v184_v50 }
  0x2b   :  { %1825 = vmatmul.mubr.f32.gmra.mxu0 %v193_v57  ;;  %v2127_v57 = vld [vmem:[%s2742_s2] ss:$0 sm:$0xff] }
  0x2c   :  { %1839 = vmatmul.mubr.f32.gmra.mxu1 %v194_v59  ;;  %1843 = vmatprep.mubr.f32.mxu0 %v2022_v10 }
  0x2d   :  { %1857 = vmatprep.mubr.f32.mxu1 %v2022_v10 }
  0x2f   :  { %1844 = vmatmul.mubr.f32.vlgmr.msra.gmra.mxu0 %v2024_v11 }
  0x30   :  { %1858 = vmatmul.mubr.f32.vlgmr.msra.gmra.mxu1 %v2024_v11  ;;  %1846 = vmatprep.mubr.f32.mxu0 %v2033_v15 }
  0x31   :  { %1860 = vmatprep.mubr.f32.mxu1 %v2033_v15 }
  0x33   :  { %1847 = vmatmul.mubr.f32.gmra.mxu0 %v2047_v22 }
  0x34   :  { %1861 = vmatmul.mubr.f32.gmra.mxu1 %v2047_v22  ;;  %1849 = vmatprep.mubr.f32.mxu0 %v2053_v24 }
  0x35   :  { %1863 = vmatprep.mubr.f32.mxu1 %v2053_v24 }
  0x37   :  { %1850 = vmatmul.mubr.f32.gmra.mxu0 %v2055_v25 }
  0x38   :  { %1864 = vmatmul.mubr.f32.gmra.mxu1 %v2055_v25  ;;  %1852 = vmatprep.mubr.f32.mxu0 %v2070_v34 }
  0x39   :  { %1866 = vmatprep.mubr.f32.mxu1 %v2070_v34 }
  0x3b   :  { %1853 = vmatmul.mubr.f32.gmra.mxu0 %v192_v54 }
  0x3c   :  { %1867 = vmatmul.mubr.f32.gmra.mxu1 %v192_v54 }
  0xcf   :  { %v1789_v63 = vpop.f32.mrf.mxu0 }
  0xd0   :  { %v1803_v0 = vpop.f32.mrf.mxu1 }
  0xd1   :  { %v128_v1 = vpop.f32.mrf.mxu0  ;;  %v281_v30 = vadd.f32 %v1803_v0, %v1789_v63  ;;  %v2132_v63 = vld [vmem:[%s2743_s3] ss:$0 sm:$0xff] }
  0xd2   :  { %v274_v2 = vpop.f32.mrf.mxu1 }
  0xd3   :  { %v1792_v3 = vpop.f32.mrf.mxu0  ;;  %v275_v35 = vadd.f32 %v274_v2, %v128_v1 }
  0xd4   :  { %v1806_v4 = vpop.f32.mrf.mxu1 }
  0xd5   :  { %v148_v5 = vpop.f32.mrf.mxu0  ;;  %v293_v41 = vadd.f32 %v1806_v4, %v1792_v3 }
  0xd6   :  { %v286_v6 = vpop.f32.mrf.mxu1 }
  0xd7   :  { %v287_v7 = vadd.f32 %v286_v6, %v148_v5  ;;  %v1795_v8 = vpop.f32.mrf.mxu0 }
  0xd8   :  { %v1809_v9 = vpop.f32.mrf.mxu1 }
  0xd9   :  { %v305_v10 = vadd.f32 %v1809_v9, %v1795_v8  ;;  %v168_v11 = vpop.f32.mrf.mxu0 }
  0xda   :  { %v298_v12 = vpop.f32.mrf.mxu1 }
  0xdb   :  { %v299_v13 = vadd.f32 %v298_v12, %v168_v11  ;;  %v1798_v14 = vpop.f32.mrf.mxu0 }
  0xdc   :  { %v1812_v15 = vpop.f32.mrf.mxu1 }
  0xdd   :  { %v317_v16 = vadd.f32 %v1812_v15, %v1798_v14  ;;  %v188_v17 = vpop.f32.mrf.mxu0 }
  0xde   :  { %v310_v18 = vpop.f32.mrf.mxu1 }
  0xdf   :  { %v311_v19 = vadd.f32 %v310_v18, %v188_v17  ;;  %v1817_v20 = vpop.f32.mrf.mxu0 }
  0xe0   :  { %v1831_v21 = vpop.f32.mrf.mxu1  ;;  %v398_v36 = vadd.f32 %v1817_v20, %v281_v30 }
  0xe1   :  { %v390_v22 = vpop.f32.mrf.mxu0 }
  0xe2   :  { %v513_v23 = vpop.f32.mrf.mxu1  ;;  %v391_v42 = vadd.f32 %v390_v22, %v275_v35  ;;  %v522_v47 = vadd.f32 %v1831_v21, %v398_v36 }
  0xe3   :  { %v1820_v24 = vpop.f32.mrf.mxu0 }
  0xe4   :  { %v1834_v25 = vpop.f32.mrf.mxu1  ;;  %v412_v48 = vadd.f32 %v1820_v24, %v293_v41  ;;  %v514_v53 = vadd.f32 %v513_v23, %v391_v42  ;;  %v1967_v42 = vmov 2475754826  }
  0xe5   :  { %v404_v26 = vpop.f32.mrf.mxu0 }
  0xe6   :  { %v405_v27 = vadd.f32 %v404_v26, %v287_v7  ;;  %v529_v28 = vpop.f32.mrf.mxu1  ;;  %v538_v59 = vadd.f32 %v1834_v25, %v412_v48 }
  0xe7   :  { %v1823_v29 = vpop.f32.mrf.mxu0 }
  0xe8   :  { %v530_v31 = vadd.f32 %v529_v28, %v405_v27  ;;  %v426_v32 = vadd.f32 %v1823_v29, %v305_v10  ;;  %v1837_v33 = vpop.f32.mrf.mxu1 }
  0xe9   :  { %v418_v34 = vpop.f32.mrf.mxu0 }
  0xea   :  { %v2116_v37 = vadd.f32 %v1837_v33, %v426_v32  ;;  %v419_v38 = vadd.f32 %v418_v34, %v299_v13  ;;  %v545_v39 = vpop.f32.mrf.mxu1 }
  0xeb   :  { %v1826_v40 = vpop.f32.mrf.mxu0 }
  0xec   :  { %v2118_v43 = vadd.f32 %v545_v39, %v419_v38  ;;  %v440_v44 = vadd.f32 %v1826_v40, %v317_v16  ;;  %v1840_v45 = vpop.f32.mrf.mxu1  ;;  %v1966_v40 = vmov 683565275  }
  0xed   :  { %v432_v46 = vpop.f32.mrf.mxu0 }
  0xee   :  { %v2120_v49 = vadd.f32 %v1840_v45, %v440_v44  ;;  %v433_v50 = vadd.f32 %v432_v46, %v311_v19  ;;  %v561_v51 = vpop.f32.mrf.mxu1  ;;  %v1968_v45 = vmov 2131351028  }
  0xef   :  { %v1845_v52 = vpop.f32.mrf.mxu0 }
  0xf0   :  { %v2122_v54 = vadd.f32 %v561_v51, %v433_v50  ;;  %v650_v55 = vadd.f32 %v1845_v52, %v522_v47  ;;  %v1859_v56 = vpop.f32.mrf.mxu1  ;;  %v1969_v47 = vmov 2102212464   ;;  %v1970_v50 = vmov 920167782  }
  0xf1   :  { %v643_v58 = vpop.f32.mrf.mxu0 }
  0xf2   :  { %v764_v60 = vadd.f32 %v1859_v56, %v650_v55  ;;  %v644_v61 = vadd.f32 %v643_v58, %v514_v53  ;;  %v757_v62 = vpop.f32.mrf.mxu1 }
  0xf3   :  { %v1848_v0 = vpop.f32.mrf.mxu0 }
  0xf4   :  { %v811_v1 = vmul.f32 %v2127_v57, %v764_v60  ;;  %v758_v2 = vadd.f32 %v757_v62, %v644_v61  ;;  %v662_v3 = vadd.f32 %v1848_v0, %v538_v59  ;;  %v1862_v4 = vpop.f32.mrf.mxu1  ;;  %v1971_v59 = vmov 1326507024  }
  0xf5   :  { %v655_v8 = vpop.f32.mrf.mxu0 }
  0xf6   :  { %v2136_v5 = vadd.f32 %v2132_v63, %v811_v1  ;;  %v810_v6 = vmul.f32 %v2127_v57, %v758_v2  ;;  %v776_v7 = vadd.f32 %v1862_v4, %v662_v3  ;;  %v656_v14 = vadd.f32 %v655_v8, %v530_v31  ;;  %v769_v18 = vpop.f32.mrf.mxu1 }
  0xf8   :  { %v937_v9 = vand.u32 2147483647, %v2136_v5  ;;  %v940_v10 = vand.u32 2139095040, %v2136_v5  ;;  %v2142_v11 = vadd.f32 %v2132_v63, %v810_v6  ;;  %v813_v12 = vmul.f32 %v2127_v57, %v776_v7 }
  0xf9   :  { %v770_v24 = vadd.f32 %v769_v18, %v656_v14  ;;  %vm939_vm15 = vcmp.lt.s32.totalorder %v2136_v5, 0 }
  0xfa   :  { %v941_v13 = vshrl.u32 %v940_v10, 23  ;;  %v944_v15 = vand.u32 8388607, %v937_v9  ;;  %v833_v16 = vand.u32 2147483647, %v2142_v11  ;;  %v836_v17 = vand.u32 2139095040, %v2142_v11 }
  0xfb   :  { %v2150_v20 = vadd.f32 %v2132_v63, %v813_v12  ;;  %v2156_v33 = vmul.f32 %v2127_v57, %v770_v24  ;;  %vm2257_vm0 = vcmp.le.f32.partialorder %v937_v9, 0.7853982 }
  0xfc   :  { %v1703_v19 = vadd.s32 4294967169, %v941_v13  ;;  %v837_v21 = vshrl.u32 %v836_v17, 23  ;;  %v840_v22 = vand.u32 8388607, %v833_v16  ;;  %v945_v25 = vor.u32 8388608, %v944_v15 }
  0xfd   :  { %v1148_v28 = vand.u32 2139095040, %v2150_v20  ;;  %v1145_v36 = vand.u32 2147483647, %v2150_v20 }
  0xfe   :  { %v947_v23 = vadd.s32 1, %v1703_v19  ;;  %v1699_v26 = vadd.s32 4294967169, %v837_v21  ;;  %v841_v27 = vor.u32 8388608, %v840_v22  ;;  %v2158_v34 = vshll.u32 %v945_v25, 8 }
  0xff   :  { %v1149_v38 = vshrl.u32 %v1148_v28, 23 }
 0x100   :  { %vm948_vm2 = vcmp.gt.s32.totalorder %v947_v23, 0  ;;  %v843_v30 = vadd.s32 1, %v1699_v26  ;;  %v2160_v35 = vshll.u32 %v841_v27, 8 }
 0x101   :  { %v949_v29 = vsel %vm948_vm2, %v947_v23, 0  ;;  %v1711_v21 = vadd.s32 4294967169, %v1149_v38 }
 0x102   :  { %v950_v31 = vshrl.u32 %v949_v29, 5  ;;  %v951_v32 = vand.u32 31, %v949_v29  ;;  %vm844_vm3 = vcmp.gt.s32.totalorder %v843_v30, 0 }
 0x103   :  { %v845_v1 = vsel %vm844_vm3, %v843_v30, 0 }
 0x104   :  { %v952_v39 = vsub.s32 32, %v951_v32  ;;  %v954_v41 = vshll.u32 %v1966_v40, %v951_v32  ;;  %v957_v44 = vshll.u32 %v1967_v42, %v951_v32  ;;  %v960_v46 = vshll.u32 %v1968_v45, %v951_v32 }
 0x105   :  { %v963_v48 = vshll.u32 %v1969_v47, %v951_v32  ;;  %v966_v51 = vshll.u32 %v1970_v50, %v951_v32  ;;  %vm969_vm4 = vcmp.lt.s32.totalorder %v950_v31, 1  ;;  %vm970_vm5 = vcmp.lt.s32.totalorder %v950_v31, 2 }
 0x106   :  { %v955_v52 = vshrl.u32 %v1967_v42, %v952_v39  ;;  %v958_v53 = vshrl.u32 %v1968_v45, %v952_v39  ;;  %v961_v55 = vshrl.u32 %v1969_v47, %v952_v39  ;;  %v953_v56 = vshrl.u32 %v1966_v40, %v952_v39 }
 0x107   :  { %v964_v58 = vshrl.u32 %v1970_v50, %v952_v39  ;;  %v967_v60 = vshrl.u32 %v1971_v59, %v952_v39  ;;  %vm971_vm6 = vcmp.lt.s32.totalorder %v950_v31, 3  ;;  %vm972_vm7 = vcmp.lt.s32.totalorder %v950_v31, 4 }
 0x108   :  { %v956_v61 = vor.u32 %v955_v52, %v954_v41  ;;  %v959_v62 = vor.u32 %v958_v53, %v957_v44  ;;  %v962_v0 = vor.u32 %v961_v55, %v960_v46  ;;  %v847_v4 = vand.u32 31, %v845_v1 }
 0x109   :  { %v965_v2 = vor.u32 %v964_v58, %v963_v48  ;;  %v968_v3 = vor.u32 %v967_v60, %v966_v51  ;;  %v846_v24 = vshrl.u32 %v845_v1, 5 }
 0x10a   :  { %v973_v6 = vsel %vm969_vm4, %v953_v56, %v956_v61  ;;  %v974_v7 = vsel %vm972_vm7, %v962_v0, 2102212464  ;;  %v977_v8 = vsel %vm969_vm4, %v956_v61, %v959_v62  ;;  %v981_v10 = vsel %vm969_vm4, %v959_v62, %v962_v0 }
 0x10b   :  { %v975_v12 = vsel %vm971_vm6, %v959_v62, %v974_v7  ;;  %v978_v13 = vsel %vm972_vm7, %v965_v2, 920167782  ;;  %v982_v14 = vsel %vm972_vm7, %v968_v3, 1326507024  ;;  %v848_v15 = vsub.s32 32, %v847_v4 }
 0x10c   :  { %v976_v17 = vsel %vm970_vm5, %v973_v6, %v975_v12  ;;  %v979_v18 = vsel %vm971_vm6, %v962_v0, %v978_v13  ;;  %v983_v19 = vsel %vm971_vm6, %v965_v2, %v982_v14  ;;  %v850_v25 = vshll.u32 %v1966_v40, %v847_v4 }
 0x10d   :  { %v980_v22 = vsel %vm970_vm5, %v977_v8, %v979_v18  ;;  %v984_v23 = vsel %vm970_vm5, %v981_v10, %v983_v19  ;;  %v992_v30 = vmul.u32 %v2158_v34, %v976_v17  ;;  %v851_v32 = vshrl.u32 %v1967_v42, %v848_v15 }
 0x10e   :  { %v2186_v26 = vmul.u32.u64.low %v2158_v34, %v984_v23  ;;  %v2187_v27 = vmul.u32.u64.high %v2158_v34, %v984_v23, %v2186_v26  ;;  %v2190_v28 = vmul.u32.u64.low %v2158_v34, %v980_v22  ;;  %v2191_v29 = vmul.u32.u64.high %v2158_v34, %v980_v22, %v2190_v28 }
 0x10f   :  { %v853_v38 = vshll.u32 %v1967_v42, %v847_v4  ;;  %v854_v31 = vshrl.u32 %v1968_v45, %v848_v15  ;;  %v856_v39 = vshll.u32 %v1968_v45, %v847_v4  ;;  %v857_v41 = vshrl.u32 %v1969_v47, %v848_v15 }
 0x110   :  { %v859_v44 = vshll.u32 %v1969_v47, %v847_v4  ;;  %v860_v46 = vshrl.u32 %v1970_v50, %v848_v15  ;;  %v852_v48 = vor.u32 %v851_v32, %v850_v25  ;;  %v862_v52 = vshll.u32 %v1970_v50, %v847_v4 }
 0x111   :  { %v855_v51 = vor.u32 %v854_v31, %v853_v38  ;;  %v863_v34 = vshrl.u32 %v1971_v59, %v848_v15  ;;  %vm994_vm8 = vc.u32 %v2187_v27, %v2190_v28  ;;  %v995_v53 = vadd.s32 1, %v2191_v29 }
 0x112   :  { %v849_v55 = vshrl.u32 %v1966_v40, %v848_v15  ;;  %v858_v56 = vor.u32 %v857_v41, %v856_v39  ;;  %v861_v58 = vor.u32 %v860_v46, %v859_v44  ;;  %vm865_vm9 = vcmp.lt.s32.totalorder %v846_v24, 1 }
 0x113   :  { %v864_v60 = vor.u32 %v863_v34, %v862_v52  ;;  %vm866_vm10 = vcmp.lt.s32.totalorder %v846_v24, 2  ;;  %v996_v61 = vsel %vm994_vm8, %v995_v53, %v2191_v29  ;;  %vm867_vm11 = vcmp.lt.s32.totalorder %v846_v24, 3 }
 0x114   :  { %vm868_vm12 = vcmp.lt.s32.totalorder %v846_v24, 4  ;;  %v873_v62 = vsel %vm865_vm9, %v852_v48, %v855_v51  ;;  %v997_v0 = vadd.s32 %v996_v61, %v992_v30  ;;  %v877_v3 = vsel %vm865_vm9, %v855_v51, %v858_v56  ;;  %v1851_v24 = vpop.f32.mrf.mxu0 }
 0x115   :  { %v870_v1 = vsel %vm868_vm12, %v858_v56, 2102212464  ;;  %v874_v2 = vsel %vm868_vm12, %v861_v58, 920167782  ;;  %v869_v4 = vsel %vm865_vm9, %v849_v55, %v852_v48  ;;  %v878_v7 = vsel %vm868_vm12, %v864_v60, 1326507024 }
 0x116   :  { %v875_v6 = vsel %vm867_vm11, %v858_v56, %v874_v2  ;;  %v1155_v8 = vadd.s32 1, %v1711_v21  ;;  %v998_v10 = vadd.s32 536870912, %v997_v0  ;;  %v871_v12 = vsel %vm867_vm11, %v855_v51, %v870_v1 }
 0x117   :  { %v876_v13 = vsel %vm866_vm10, %v873_v62, %v875_v6  ;;  %v879_v14 = vsel %vm867_vm11, %v861_v58, %v878_v7  ;;  %v2218_v19 = vadd.f32 %v2132_v63, %v2156_v33  ;;  %v872_v25 = vsel %vm866_vm10, %v869_v4, %v871_v12 }
 0x118   :  { %v880_v15 = vsel %vm866_vm10, %v877_v3, %v879_v14  ;;  %v2212_v17 = vmul.u32.u64.low %v2160_v35, %v876_v13  ;;  %v2213_v18 = vmul.u32.u64.high %v2160_v35, %v876_v13, %v2212_v17  ;;  %v999_v22 = vshrl.u32 %v998_v10, 30 }
 0x119   :  { %v2221_v23 = vmul.u32.u64.low %v2160_v35, %v880_v15  ;;  %v2222_v21 = vmul.u32.u64.high %v2160_v35, %v880_v15, %v2221_v23  ;;  %vm1156_vm13 = vcmp.gt.s32.totalorder %v1155_v8, 0  ;;  %v2228_v38 = vand.u32 8388607, %v1145_v36 }
 0x11a   :  { %v1157_v26 = vsel %vm1156_vm13, %v1155_v8, 0  ;;  %v1000_v29 = vshll.u32 %v999_v22, 30  ;;  %v891_v32 = vadd.s32 1, %v2213_v18  ;;  %v1044_v33 = vand.u32 2139095040, %v2218_v19 }
 0x11b   :  { %v1159_v30 = vand.u32 31, %v1157_v26  ;;  %v888_v39 = vmul.u32 %v2160_v35, %v872_v25  ;;  %vm890_vm14 = vc.u32 %v2222_v21, %v2212_v17  ;;  %v1153_v51 = vor.u32 8388608, %v2228_v38 }
 0x11c   :  { %v2231_v31 = vsub.s32 %v997_v0, %v1000_v29  ;;  %v892_v41 = vsel %vm890_vm14, %v891_v32, %v2213_v18  ;;  %v1045_v52 = vshrl.u32 %v1044_v33, 23  ;;  %v2241_v34 = vadd.f32 %v1851_v24, %v2116_v37 }
 0x11d   :  { %v1160_v44 = vsub.s32 32, %v1159_v30  ;;  %v893_v48 = vadd.s32 %v892_v41, %v888_v39  ;;  %v993_v58 = vadd.s32 %v2190_v28, %v2187_v27  ;;  %v1158_v60 = vshrl.u32 %v1157_v26, 5 }
 0x11e   :  { %v1003_v46 = vsub.s32 0, %v2231_v31  ;;  %v1168_v62 = vshll.u32 %v1968_v45, %v1159_v30  ;;  %v1023_v1 = vsub.s32 4, %v999_v22  ;;  %v1162_v37 = vshll.u32 %v1966_v40, %v1159_v30 }
 0x11f   :  { %v894_v53 = vadd.s32 536870912, %v893_v48  ;;  %v1163_v55 = vshrl.u32 %v1967_v42, %v1160_v44  ;;  %v1169_v56 = vshrl.u32 %v1969_v47, %v1160_v44  ;;  %v1166_v61 = vshrl.u32 %v1968_v45, %v1160_v44 }
 0x120   :  { %v1704_v35 = vmin.u32 %v1003_v46, %v2231_v31  ;;  %v1172_v2 = vshrl.u32 %v1970_v50, %v1160_v44  ;;  %v1165_v4 = vshll.u32 %v1967_v42, %v1159_v30  ;;  %v1707_v7 = vadd.s32 4294967169, %v1045_v52 }
 0x121   :  { %v2252_v3 = vshrl.u32 %v894_v53, 30  ;;  %v1170_v6 = vor.u32 %v1169_v56, %v1168_v62  ;;  %v1164_v8 = vor.u32 %v1163_v55, %v1162_v37  ;;  %v1171_v10 = vshll.u32 %v1969_v47, %v1159_v30 }
 0x122   :  { %v1005_v0 = vclz %v1704_v35  ;;  %v1175_v12 = vshrl.u32 %v1971_v59, %v1160_v44  ;;  %v1167_v14 = vor.u32 %v1166_v61, %v1165_v4  ;;  %v1174_v15 = vshll.u32 %v1970_v50, %v1159_v30 }
 0x123   :  { %v896_v13 = vshll.u32 %v2252_v3, 30  ;;  %vm1180_vm1 = vcmp.lt.s32.totalorder %v1158_v60, 4  ;;  %v1024_v18 = vsel %vm939_vm15, %v1023_v1, %v999_v22  ;;  %v1173_v9 = vor.u32 %v1172_v2, %v1171_v10 }
 0x124   :  { %v1705_v28 = vadd.s32 4294967294, %v1005_v0  ;;  %v1182_v23 = vsel %vm1180_vm1, %v1170_v6, 2102212464  ;;  %v1161_v29 = vshrl.u32 %v1966_v40, %v1160_v44  ;;  %v1176_v32 = vor.u32 %v1175_v12, %v1174_v15 }
 0x125   :  { %v2268_v26 = vsub.s32 %v893_v48, %v896_v13  ;;  %vm1177_vm3 = vcmp.lt.s32.totalorder %v1158_v60, 1  ;;  %vm1179_vm4 = vcmp.lt.s32.totalorder %v1158_v60, 3  ;;  %vm835_vm5 = vcmp.lt.s32.totalorder %v2142_v11, 0 }
 0x126   :  { %vm1706_vm2 = vcmp.lt.s32.totalorder %v1705_v28, 0  ;;  %v1181_v24 = vsel %vm1177_vm3, %v1161_v29, %v1164_v8  ;;  %v1183_v22 = vsel %vm1179_vm4, %v1167_v14, %v1182_v23  ;;  %v1185_v48 = vsel %vm1177_vm3, %v1164_v8, %v1167_v14  ;;  %v1865_v8 = vpop.f32.mrf.mxu1 }
 0x127   :  { %v1008_v25 = vsel %vm1706_vm2, 0, %v1705_v28  ;;  %v899_v39 = vsub.s32 0, %v2268_v26  ;;  %v1186_v52 = vsel %vm1180_vm1, %v1173_v9, 920167782  ;;  %v1189_v53 = vsel %vm1177_vm3, %v1167_v14, %v1170_v6 }
 0x128   :  { %v1009_v38 = vsub.s32 32, %v1008_v25  ;;  %v1013_v33 = vsub.s32 4294967266, %v1008_v25  ;;  %v1010_v30 = vshll.u32 %v2231_v31, %v1008_v25  ;;  %v1187_v35 = vsel %vm1179_vm4, %v1170_v6, %v1186_v52 }
 0x129   :  { %v1700_v44 = vmin.u32 %v899_v39, %v2268_v26  ;;  %v1190_v55 = vsel %vm1180_vm1, %v1176_v32, 1326507024  ;;  %vm1178_vm6 = vcmp.lt.s32.totalorder %v1158_v60, 2  ;;  %vm2284_vm7 = vcmp.le.f32.partialorder %v833_v16, 0.7853982 }
 0x12a   :  { %v1011_v41 = vshrl.u32 %v993_v58, %v1009_v38  ;;  %v1014_v46 = vadd.s32 127, %v1013_v33  ;;  %v1191_v61 = vsel %vm1179_vm4, %v1173_v9, %v1190_v55  ;;  %v1026_v58 = vsel %vm2257_vm0, 0, %v1024_v18 }
 0x12b   :  { %v901_v0 = vclz %v1700_v44  ;;  %v1188_v1 = vsel %vm1178_vm6, %v1185_v48, %v1187_v35  ;;  %v1193_v37 = vshll.u32 %v1153_v51, 8  ;;  %v919_v4 = vsub.s32 4, %v2252_v3 }
 0x12c   :  { %v1012_v31 = vor.u32 %v1011_v41, %v1010_v30  ;;  %v1015_v56 = vshll.u32 %v1014_v46, 23  ;;  %v1184_v6 = vsel %vm1178_vm6, %v1181_v24, %v1183_v22  ;;  %v1192_v28 = vsel %vm1178_vm6, %v1189_v53, %v1191_v61  ;;  %v667_v46 = vpop.f32.mrf.mxu0 }
 0x12d   :  { %v1701_v10 = vadd.s32 4294967294, %v901_v0  ;;  %v2289_v12 = vmul.u32.u64.low %v1193_v37, %v1192_v28  ;;  %v2290_v13 = vmul.u32.u64.high %v1193_v37, %v1192_v28, %v2289_v12  ;;  %v1051_v18 = vadd.s32 1, %v1707_v7 }
 0x12e   :  { %v1016_v2 = vor.u32 4788187, %v1015_v56  ;;  %v1019_v60 = vcvt.s32.f32 %v1012_v31  ;;  %v2292_v15 = vmul.u32.u64.low %v1193_v37, %v1188_v1  ;;  %v2293_v16 = vmul.u32.u64.high %v1193_v37, %v1188_v1, %v2292_v15 }
 0x12f   :  { %v889_v51 = vadd.s32 %v2212_v17, %v2222_v21  ;;  %vm1702_vm8 = vcmp.lt.s32.totalorder %v1701_v10, 0  ;;  %v1041_v9 = vand.u32 2147483647, %v2218_v19  ;;  %v788_v23 = vadd.f32 %v1865_v8, %v2241_v34 }
 0x130   :  { %v1017_v14 = vand.u32 2147483647, %v1016_v2  ;;  %v1030_v29 = vadd.s32 3, %v1026_v58  ;;  %v904_v32 = vsel %vm1702_vm8, 0, %v1701_v10  ;;  %vm1052_vm9 = vcmp.gt.s32.totalorder %v1051_v18, 0 }
 0x131   :  { %v905_v38 = vsub.s32 32, %v904_v32  ;;  %v909_v33 = vsub.s32 4294967266, %v904_v32  ;;  %v920_v30 = vsel %vm835_vm5, %v919_v4, %v2252_v3  ;;  %v1200_v39 = vmul.u32 %v1193_v37, %v1184_v6 }
 0x132   :  { %v1020_v25 = vmul.f32 %v1019_v60, %v1017_v14  ;;  %vm1202_vm10 = vc.u32 %v2290_v13, %v2292_v15  ;;  %v1203_v17 = vadd.s32 1, %v2293_v16  ;;  %v1053_v21 = vsel %vm1052_vm9, %v1051_v18, 0 }
 0x133   :  { %v906_v34 = vshll.u32 %v2268_v26, %v904_v32  ;;  %v907_v24 = vshrl.u32 %v889_v51, %v905_v38  ;;  %v910_v22 = vadd.s32 127, %v909_v33  ;;  %v1055_v41 = vand.u32 31, %v1053_v21  ;;  %v781_v38 = vpop.f32.mrf.mxu1 }
 0x134   :  { %v1021_v7 = vxor.u32 2147483648, %v1020_v25  ;;  %v922_v3 = vsel %vm2284_vm7, 0, %v920_v30  ;;  %v1204_v52 = vsel %vm1202_vm10, %v1203_v17, %v2293_v16  ;;  %v1048_v44 = vand.u32 8388607, %v1041_v9 }
 0x135   :  { %v908_v26 = vor.u32 %v907_v24, %v906_v34  ;;  %v911_v53 = vshll.u32 %v910_v22, 23  ;;  %v1205_v55 = vadd.s32 %v1204_v52, %v1200_v39  ;;  %v1056_v31 = vsub.s32 32, %v1055_v41 }
 0x136   :  { %v1022_v48 = vsel %vm939_vm15, %v1021_v7, %v1020_v25  ;;  %v668_v56 = vadd.f32 %v667_v46, %v2118_v43  ;;  %v2318_v61 = vand.u32 3, %v1030_v29  ;;  %v926_v37 = vadd.s32 3, %v922_v3 }
 0x137   :  { %v1025_v35 = vsel %vm2257_vm0, %v2136_v5, %v1022_v48  ;;  %v912_v58 = vor.u32 4788187, %v911_v53  ;;  %v1206_v0 = vadd.s32 536870912, %v1205_v55  ;;  %v915_v1 = vcvt.s32.f32 %v908_v26 }
 0x138   :  { %1910 = vcosq.f32 %v1025_v35  ;;  %v1049_v2 = vor.u32 8388608, %v1048_v44  ;;  %v815_v4 = vmul.f32 %v2127_v57, %v788_v23  ;;  %v1059_v28 = vshrl.u32 %v1967_v42, %v1056_v31 }
 0x139   :  { %1912 = vsinq.f32 %v1025_v35  ;;  %v913_v6 = vand.u32 2147483647, %v912_v58  ;;  %v2321_v27 = vshrl.u32 %v1206_v0, 30  ;;  %v1062_v8 = vshrl.u32 %v1968_v45, %v1056_v31 }
 0x13a   :  { %v2325_v60 = vshrl.u32 %v1053_v21, 5  ;;  %v1065_v43 = vshrl.u32 %v1969_v47, %v1056_v31  ;;  %v1067_v10 = vshll.u32 %v1969_v47, %v1055_v41  ;;  %v1068_v12 = vshrl.u32 %v1970_v50, %v1056_v31 }
 0x13b   :  { %v916_v14 = vmul.f32 %v915_v1, %v913_v6  ;;  %v1208_v16 = vshll.u32 %v2321_v27, 30  ;;  %v1058_v18 = vshll.u32 %v1966_v40, %v1055_v41  ;;  %v1061_v51 = vshll.u32 %v1967_v42, %v1055_v41 }
 0x13c   :  { %v1064_v23 = vshll.u32 %v1968_v45, %v1055_v41  ;;  %v1069_v25 = vor.u32 %v1068_v12, %v1067_v10  ;;  %v1070_v29 = vshll.u32 %v1970_v50, %v1055_v41  ;;  %v1071_v32 = vshrl.u32 %v1971_v59, %v1056_v31 }
 0x13d   :  { %vm1036_vm11 = vcmp.eq.s32.totalorder %v2318_v61, 2  ;;  %v917_v33 = vxor.u32 2147483648, %v916_v14  ;;  %v2337_v30 = vsub.s32 %v1205_v55, %v1208_v16  ;;  %v1060_v39 = vor.u32 %v1059_v28, %v1058_v18 }
 0x13e   :  { %v1063_v7 = vor.u32 %v1062_v8, %v1061_v51  ;;  %vm1033_vm12 = vcmp.eq.s32.totalorder %v2318_v61, 0  ;;  %v2340_v17 = vand.u32 3, %v926_v37  ;;  %v1066_v21 = vor.u32 %v1065_v43, %v1064_v23 }
 0x13f   :  { %v1072_v34 = vor.u32 %v1071_v32, %v1070_v29  ;;  %v2342_v24 = vshll.u32 %v1049_v2, 8  ;;  %vm1032_vm13 = vcmp.lt.s32.totalorder %v2318_v61, 2  ;;  %v918_v22 = vsel %vm835_vm5, %v917_v33, %v916_v14 }
 0x140   :  { %v1211_v41 = vsub.s32 0, %v2337_v30  ;;  %vm1076_vm14 = vcmp.lt.s32.totalorder %v2325_v60, 4  ;;  %v2349_v46 = vadd.f32 %v781_v38, %v668_v56  ;;  %vm1029_vm15 = vweird.f32 %v2136_v5 }
 0x141   :  { %v921_v48 = vsel %vm2284_vm7, %v2142_v11, %v918_v22  ;;  %vm1073_vm0 = vcmp.lt.s32.totalorder %v2325_v60, 1  ;;  %v1082_v3 = vsel %vm1076_vm14, %v1069_v25, 920167782  ;;  %v2359_v52 = vadd.f32 %v2132_v63, %v815_v4 }
 0x142   :  { %1914 = vcosq.f32 %v921_v48  ;;  %vm1147_vm1 = vcmp.lt.s32.totalorder %v2150_v20, 0  ;;  %v1712_v44 = vmin.u32 %v1211_v41, %v2337_v30  ;;  %vm1075_vm2 = vcmp.lt.s32.totalorder %v2325_v60, 3 }
 0x143   :  { %v1081_v35 = vsel %vm1073_vm0, %v1060_v39, %v1063_v7  ;;  %1916 = vsinq.f32 %v921_v48  ;;  %v1083_v62 = vsel %vm1075_vm2, %v1066_v21, %v1082_v3  ;;  %v1085_v26 = vsel %vm1073_vm0, %v1063_v7, %v1066_v21 }
 0x144   :  { %v1086_v53 = vsel %vm1076_vm14, %v1072_v34, 1326507024  ;;  %v1213_v56 = vclz %v1712_v44  ;;  %v1057_v58 = vshrl.u32 %v1966_v40, %v1056_v31  ;;  %vm1074_vm3 = vcmp.lt.s32.totalorder %v2325_v60, 2 }
 0x145   :  { %v1911_v55 = vpop.eup %1910  ;;  %v1078_v0 = vsel %vm1076_vm14, %v1066_v21, 2102212464  ;;  %v1231_v2 = vsub.s32 4, %v2321_v27  ;;  %v1084_v4 = vsel %vm1074_vm3, %v1081_v35, %v1083_v62  ;;  %v1087_v6 = vsel %vm1075_vm2, %v1069_v25, %v1086_v53 }
 0x146   :  { %v1913_v1 = vpop.eup %1912  ;;  %v1037_v37 = vxor.u32 2147483648, %v1911_v55  ;;  %v1713_v8 = vadd.s32 4294967294, %v1213_v56  ;;  %v1077_v31 = vsel %vm1073_vm0, %v1057_v58, %v1060_v39  ;;  %v1088_v43 = vsel %vm1074_vm3, %v1085_v26, %v1087_v6 }
 0x147   :  { %v1034_v28 = vxor.u32 2147483648, %v1913_v1  ;;  %v1079_v12 = vsel %vm1075_vm2, %v1063_v7, %v1078_v0  ;;  %v2390_v14 = vmul.u32.u64.low %v2342_v24, %v1088_v43  ;;  %v2391_v16 = vmul.u32.u64.high %v2342_v24, %v1088_v43, %v2390_v14 }
 0x148   :  { %v1038_v10 = vsel %vm1036_vm11, %v1037_v37, %v1913_v1  ;;  %vm1714_vm4 = vcmp.lt.s32.totalorder %v1713_v8, 0  ;;  %v2396_v51 = vmul.u32.u64.low %v2342_v24, %v1084_v4  ;;  %v2397_v23 = vmul.u32.u64.high %v2342_v24, %v1084_v4, %v2396_v51 }
 0x149   :  { %v1035_v18 = vsel %vm1033_vm12, %v1911_v55, %v1034_v28  ;;  %v1201_v29 = vadd.s32 %v2292_v15, %v2290_v13  ;;  %v1216_v32 = vsel %vm1714_vm4, 0, %v1713_v8  ;;  %v1356_v38 = vand.u32 2139095040, %v2359_v52 }
 0x14a   :  { %v1039_v25 = vsel %vm1032_vm13, %v1035_v18, %v1038_v10  ;;  %v1217_v39 = vsub.s32 32, %v1216_v32  ;;  %v1221_v7 = vsub.s32 4294967266, %v1216_v32  ;;  %v1080_v21 = vsel %vm1074_vm3, %v1077_v31, %v1079_v12  ;;  %v1854_v12 = vpop.f32.mrf.mxu0 }
 0x14b   :  { %v1040_v33 = vsel %vm1029_vm15, nan, %v1039_v25  ;;  %v1232_v61 = vsel %vm1147_vm1, %v1231_v2, %v2321_v27  ;;  %vm1098_vm5 = vc.u32 %v2391_v16, %v2396_v51  ;;  %v1357_v13 = vshrl.u32 %v1356_v38, 23 }
 0x14c   :  { %v1666_v34 = vmul.f32 0.5, %v1040_v33  ;;  %v1218_v15 = vshll.u32 %v2337_v30, %v1216_v32  ;;  %v1219_v22 = vshrl.u32 %v1201_v29, %v1217_v39  ;;  %v1222_v41 = vadd.s32 127, %v1221_v7 }
 0x14d   :  { %v1099_v5 = vadd.s32 1, %v2397_v23  ;;  %vm928_vm6 = vcmp.lt.s32.totalorder %v2340_v17, 2  ;;  %vm2419_vm7 = vcmp.le.f32.partialorder %v1145_v36, 0.7853982  ;;  %v1096_v27 = vmul.u32 %v2342_v24, %v1080_v21 }
 0x14e   :  { %1674 = vst [vmem:[#allocation2 + $0x8] sm:$0xff] %v1666_v34  ;;  %v1719_v48 = vadd.s32 4294967169, %v1357_v13  ;;  %v1220_v3 = vor.u32 %v1219_v22, %v1218_v15  ;;  %v1223_v44 = vshll.u32 %v1222_v41, 23  ;;  %v1234_v30 = vsel %vm2419_vm7, 0, %v1232_v61 }
 0x14f   :  { %v1100_v35 = vsel %vm1098_vm5, %v1099_v5, %v2397_v23  ;;  %v1915_v62 = vpop.eup %1914  ;;  %vm929_vm8 = vcmp.eq.s32.totalorder %v2340_v17, 0  ;;  %v1353_v53 = vand.u32 2147483647, %v2359_v52  ;;  %vm932_vm9 = vcmp.eq.s32.totalorder %v2340_v17, 2 }
 0x150   :  { %v1101_v26 = vadd.s32 %v1100_v35, %v1096_v27  ;;  %v1363_v36 = vadd.s32 1, %v1719_v48  ;;  %v1917_v55 = vpop.eup %1916  ;;  %v933_v56 = vxor.u32 2147483648, %v1915_v62  ;;  %v1224_v24 = vor.u32 4788187, %v1223_v44 }
 0x151   :  { %v814_v58 = vmul.f32 %v2127_v57, %v2349_v46  ;;  %v930_v0 = vxor.u32 2147483648, %v1917_v55  ;;  %v1238_v1 = vadd.s32 3, %v1234_v30  ;;  %v1227_v6 = vcvt.s32.f32 %v1220_v3 }
 0x152   :  { %v1102_v37 = vadd.s32 536870912, %v1101_v26  ;;  %vm1364_vm10 = vcmp.gt.s32.totalorder %v1363_v36, 0  ;;  %v934_v2 = vsel %vm932_vm9, %v933_v56, %v1917_v55  ;;  %v1225_v4 = vand.u32 2147483647, %v1224_v24 }
 0x153   :  { %v1365_v28 = vsel %vm1364_vm10, %v1363_v36, 0  ;;  %v931_v8 = vsel %vm929_vm8, %v1915_v62, %v930_v0  ;;  %v1360_v43 = vand.u32 8388607, %v1353_v53  ;;  %vm925_vm11 = vweird.f32 %v2142_v11 }
 0x154   :  { %v2434_v31 = vshrl.u32 %v1102_v37, 30  ;;  %v1367_v10 = vand.u32 31, %v1365_v28  ;;  %v935_v46 = vsel %vm928_vm6, %v931_v8, %v934_v2  ;;  %v1228_v14 = vmul.f32 %v1227_v6, %v1225_v4  ;;  %v2553_v6 = vld [vmem:[%s2743_s3] ss:$0 sm:$0xff] }
 0x155   :  { %v2442_v18 = vadd.f32 %v2132_v63, %v814_v58  ;;  %v936_v23 = vsel %vm925_vm11, nan, %v935_v46  ;;  %v2446_v33 = vadd.f32 %v1854_v12, %v2120_v49  ;;  %v2448_v39 = vand.u32 3, %v1238_v1 }
 0x156   :  { %v1104_v25 = vshll.u32 %v2434_v31, 30  ;;  %v1368_v29 = vsub.s32 32, %v1367_v10  ;;  %v1665_v32 = vmul.f32 0.5, %v936_v23  ;;  %v1229_v38 = vxor.u32 2147483648, %v1228_v14 }
 0x157   :  { %v1361_v11 = vor.u32 8388608, %v1360_v43  ;;  %v1370_v21 = vshll.u32 %v1966_v40, %v1367_v10  ;;  %v1252_v61 = vand.u32 2139095040, %v2442_v18  ;;  %v1366_v15 = vshrl.u32 %v1365_v28, 5 }
 0x158   :  { %v2450_v7 = vsub.s32 %v1101_v26, %v1104_v25  ;;  %v1371_v17 = vshrl.u32 %v1967_v42, %v1368_v29  ;;  %1673 = vst [vmem:[#allocation2] sm:$0xff] %v1665_v32  ;;  %v1230_v63 = vsel %vm1147_vm1, %v1229_v38, %v1228_v14  ;;  %v1374_v34 = vshrl.u32 %v1968_v45, %v1368_v29 }
 0x159   :  { %v1233_v49 = vsel %vm2419_vm7, %v2150_v20, %v1230_v63  ;;  %v1373_v22 = vshll.u32 %v1967_v42, %v1367_v10  ;;  %v1376_v5 = vshll.u32 %v1968_v45, %v1367_v10  ;;  %v1377_v27 = vshrl.u32 %v1969_v47, %v1368_v29 }
 0x15a   :  { %v1107_v13 = vsub.s32 0, %v2450_v7  ;;  %1918 = vcosq.f32 %v1233_v49  ;;  %v1372_v41 = vor.u32 %v1371_v17, %v1370_v21  ;;  %v1380_v44 = vshrl.u32 %v1970_v50, %v1368_v29 }
 0x15b   :  { %1920 = vsinq.f32 %v1233_v49  ;;  %v1375_v3 = vor.u32 %v1374_v34, %v1373_v22  ;;  %v1378_v30 = vor.u32 %v1377_v27, %v1376_v5  ;;  %v1379_v60 = vshll.u32 %v1969_v47, %v1367_v10 }
 0x15c   :  { %v1708_v48 = vmin.u32 %v1107_v13, %v2450_v7  ;;  %v1382_v35 = vshll.u32 %v1970_v50, %v1367_v10  ;;  %v1383_v62 = vshrl.u32 %v1971_v59, %v1368_v29  ;;  %v1097_v26 = vadd.s32 %v2396_v51, %v2391_v16 }
 0x15d   :  { %v2472_v55 = vshll.u32 %v1361_v11, 8  ;;  %v1253_v56 = vshrl.u32 %v1252_v61, 23  ;;  %vm1043_vm12 = vcmp.lt.s32.totalorder %v2218_v19, 0  ;;  %v1369_v24 = vshrl.u32 %v1966_v40, %v1368_v29  ;;  %v1868_v29 = vpop.f32.mrf.mxu1 }
 0x15e   :  { %v1109_v36 = vclz %v1708_v48  ;;  %v1381_v58 = vor.u32 %v1380_v44, %v1379_v60  ;;  %v1384_v0 = vor.u32 %v1383_v62, %v1382_v35  ;;  %vm1385_vm13 = vcmp.lt.s32.totalorder %v1366_v15, 1 }
 0x15f   :  { %vm1387_vm14 = vcmp.lt.s32.totalorder %v1366_v15, 3  ;;  %vm1388_vm15 = vcmp.lt.s32.totalorder %v1366_v15, 4  ;;  %v1393_v37 = vsel %vm1385_vm13, %v1372_v41, %v1375_v3  ;;  %v1397_v16 = vsel %vm1385_vm13, %v1375_v3, %v1378_v30 }
 0x160   :  { %v1709_v1 = vadd.s32 4294967294, %v1109_v36  ;;  %v1390_v2 = vsel %vm1388_vm15, %v1378_v30, 2102212464  ;;  %v1394_v4 = vsel %vm1388_vm15, %v1381_v58, 920167782  ;;  %vm1386_vm2 = vcmp.lt.s32.totalorder %v1366_v15, 2 }
 0x161   :  { %v1398_v51 = vsel %vm1388_vm15, %v1384_v0, 1326507024  ;;  %vm2480_vm0 = vcmp.le.f32.partialorder %v1041_v9, 0.7853982  ;;  %v1395_v28 = vsel %vm1387_vm14, %v1378_v30, %v1394_v4  ;;  %v1127_v10 = vsub.s32 4, %v2434_v31 }
 0x162   :  { %vm1710_vm1 = vcmp.lt.s32.totalorder %v1709_v1, 0  ;;  %v1399_v8 = vsel %vm1387_vm14, %v1381_v58, %v1398_v51  ;;  %v1396_v12 = vsel %vm1386_vm2, %v1393_v37, %v1395_v28  ;;  %vm1240_vm3 = vcmp.lt.s32.totalorder %v2448_v39, 2 }
 0x163   :  { %v1112_v43 = vsel %vm1710_vm1, 0, %v1709_v1  ;;  %v1400_v46 = vsel %vm1386_vm2, %v1397_v16, %v1399_v8  ;;  %v1389_v23 = vsel %vm1385_vm13, %v1369_v24, %v1372_v41  ;;  %v1391_v25 = vsel %vm1387_vm14, %v1375_v3, %v1390_v2 }
 0x164   :  { %v1113_v14 = vsub.s32 32, %v1112_v43  ;;  %v1117_v9 = vsub.s32 4294967266, %v1112_v43  ;;  %v2493_v32 = vmul.u32.u64.low %v2472_v55, %v1400_v46  ;;  %v2494_v38 = vmul.u32.u64.high %v2472_v55, %v1400_v46, %v2493_v32 }
 0x165   :  { %v2497_v11 = vmul.u32.u64.low %v2472_v55, %v1396_v12  ;;  %v2498_v17 = vmul.u32.u64.high %v2472_v55, %v1396_v12, %v2497_v11  ;;  %v1114_v63 = vshll.u32 %v2450_v7, %v1112_v43  ;;  %v1715_v61 = vadd.s32 4294967169, %v1253_v56 }
 0x166   :  { %v1115_v21 = vshrl.u32 %v1097_v26, %v1113_v14  ;;  %v1118_v34 = vadd.s32 127, %v1117_v9  ;;  %vm1241_vm4 = vcmp.eq.s32.totalorder %v2448_v39, 0  ;;  %vm1244_vm5 = vcmp.eq.s32.totalorder %v2448_v39, 2 }
 0x167   :  { %v1392_v49 = vsel %vm1386_vm2, %v1389_v23, %v1391_v25  ;;  %v800_v13 = vadd.f32 %v1868_v29, %v2446_v33  ;;  %v1919_v22 = vpop.eup %1918  ;;  %v1128_v27 = vsel %vm1043_vm12, %v1127_v10, %v2434_v31  ;;  %v1259_v48 = vadd.s32 1, %v1715_v61 }
 0x168   :  { %v1116_v41 = vor.u32 %v1115_v21, %v1114_v63  ;;  %v1119_v5 = vshll.u32 %v1118_v34, 23  ;;  %v1921_v7 = vpop.eup %1920  ;;  %v1245_v3 = vxor.u32 2147483648, %v1919_v22  ;;  %vm1410_vm6 = vc.u32 %v2494_v38, %v2497_v11 }
 0x169   :  { %v1411_v44 = vadd.s32 1, %v2498_v17  ;;  %v1249_v15 = vand.u32 2147483647, %v2442_v18  ;;  %v1242_v30 = vxor.u32 2147483648, %v1921_v7  ;;  %v1408_v33 = vmul.u32 %v2472_v55, %v1392_v49 }
 0x16a   :  { %v1120_v60 = vor.u32 4788187, %v1119_v5  ;;  %vm1260_vm7 = vcmp.gt.s32.totalorder %v1259_v48, 0  ;;  %v1246_v35 = vsel %vm1244_vm5, %v1245_v3, %v1921_v7  ;;  %v1130_v31 = vsel %vm2480_vm0, 0, %v1128_v27 }
 0x16b   :  { %v1412_v62 = vsel %vm1410_vm6, %v1411_v44, %v2498_v17  ;;  %v1261_v26 = vsel %vm1260_vm7, %v1259_v48, 0  ;;  %v1243_v36 = vsel %vm1241_vm4, %v1919_v22, %v1242_v30  ;;  %v1123_v24 = vcvt.s32.f32 %v1116_v41 }
 0x16c   :  { %v1121_v56 = vand.u32 2147483647, %v1120_v60  ;;  %v1413_v58 = vadd.s32 %v1412_v62, %v1408_v33  ;;  %vm1237_vm8 = vweird.f32 %v2150_v20  ;;  %v1247_v55 = vsel %vm1240_vm3, %v1243_v36, %v1246_v35 }
 0x16d   :  { %v1263_v0 = vand.u32 31, %v1261_v26  ;;  %v1248_v1 = vsel %vm1237_vm8, nan, %v1247_v55  ;;  %v1256_v4 = vand.u32 8388607, %v1249_v15  ;;  %v1134_v51 = vadd.s32 3, %v1130_v31 }
 0x16e   :  { %v1124_v37 = vmul.f32 %v1123_v24, %v1121_v56  ;;  %v1414_v2 = vadd.s32 536870912, %v1413_v58  ;;  %v1668_v16 = vmul.f32 0.5, %v1248_v1  ;;  %v817_v8 = vmul.f32 %v2127_v57, %v800_v13 }
 0x16f   :  { %v1264_v28 = vsub.s32 32, %v1263_v0  ;;  %v1266_v20 = vshll.u32 %v1966_v40, %v1263_v0  ;;  %v1269_v39 = vshll.u32 %v1967_v42, %v1263_v0  ;;  %v1272_v14 = vshll.u32 %v1968_v45, %v1263_v0 }
 0x170   :  { %v1125_v43 = vxor.u32 2147483648, %v1124_v37  ;;  %v2527_v10 = vshrl.u32 %v1414_v2, 30  ;;  %1676 = vst [vmem:[#allocation2 + $0x18] sm:$0xff] %v1668_v16  ;;  %v1275_v25 = vshll.u32 %v1969_v47, %v1263_v0  ;;  %v1262_v17 = vshrl.u32 %v1261_v26, 5 }
 0x171   :  { %v1267_v12 = vshrl.u32 %v1967_v42, %v1264_v28  ;;  %v1270_v46 = vshrl.u32 %v1968_v45, %v1264_v28  ;;  %v1273_v9 = vshrl.u32 %v1969_v47, %v1264_v28  ;;  %v1276_v29 = vshrl.u32 %v1970_v50, %v1264_v28 }
 0x172   :  { %v1126_v23 = vsel %vm1043_vm12, %v1125_v43, %v1124_v37  ;;  %v1416_v57 = vshll.u32 %v2527_v10, 30  ;;  %v1278_v13 = vshll.u32 %v1970_v50, %v1263_v0  ;;  %v1279_v22 = vshrl.u32 %v1971_v59, %v1264_v28 }
 0x173   :  { %v1129_v32 = vsel %vm2480_vm0, %v2218_v19, %v1126_v23  ;;  %v1268_v63 = vor.u32 %v1267_v12, %v1266_v20  ;;  %v1271_v21 = vor.u32 %v1270_v46, %v1269_v39  ;;  %v1274_v61 = vor.u32 %v1273_v9, %v1272_v14 }
 0x174   :  { %1922 = vcosq.f32 %v1129_v32  ;;  %v2543_v34 = vsub.s32 %v1413_v58, %v1416_v57  ;;  %v1277_v49 = vor.u32 %v1276_v29, %v1275_v25  ;;  %v2547_v41 = vand.u32 3, %v1134_v51 }
 0x175   :  { %1924 = vsinq.f32 %v1129_v32  ;;  %v1257_v27 = vor.u32 8388608, %v1256_v4  ;;  %v2556_v48 = vadd.f32 %v2553_v6, %v817_v8  ;;  %vm1355_vm9 = vcmp.lt.s32.totalorder %v2359_v52, 0 }
 0x176   :  { %v1419_v5 = vsub.s32 0, %v2543_v34  ;;  %v1280_v7 = vor.u32 %v1279_v22, %v1278_v13  ;;  %vm1281_vm10 = vcmp.lt.s32.totalorder %v1262_v17, 1  ;;  %vm1283_vm11 = vcmp.lt.s32.totalorder %v1262_v17, 3 }
 0x177   :  { %vm1284_vm12 = vcmp.lt.s32.totalorder %v1262_v17, 4  ;;  %v1289_v30 = vsel %vm1281_vm10, %v1268_v63, %v1271_v21  ;;  %v1265_v33 = vshrl.u32 %v1966_v40, %v1264_v28  ;;  %v1293_v31 = vsel %vm1281_vm10, %v1271_v21, %v1274_v61 }
 0x178   :  { %v1720_v3 = vmin.u32 %v1419_v5, %v2543_v34  ;;  %v1286_v44 = vsel %vm1284_vm12, %v1274_v61, 2102212464  ;;  %v1290_v60 = vsel %vm1284_vm12, %v1277_v49, 920167782  ;;  %v1294_v62 = vsel %vm1284_vm12, %v1280_v7, 1326507024 }
 0x179   :  { %v1291_v35 = vsel %vm1283_vm11, %v1274_v61, %v1290_v60  ;;  %v1439_v36 = vsub.s32 4, %v2527_v10  ;;  %vm1282_vm13 = vcmp.lt.s32.totalorder %v1262_v17, 2  ;;  %v1297_v56 = vshll.u32 %v1257_v27, 8  ;;  %v679_v61 = vpop.f32.mrf.mxu0 }
 0x17a   :  { %v1421_v26 = vclz %v1720_v3  ;;  %v1285_v24 = vsel %vm1281_vm10, %v1265_v33, %v1268_v63  ;;  %v1287_v58 = vsel %vm1283_vm11, %v1271_v21, %v1286_v44  ;;  %v1292_v55 = vsel %vm1282_vm13, %v1289_v30, %v1291_v35 }
 0x17b   :  { %v1295_v0 = vsel %vm1283_vm11, %v1277_v49, %v1294_v62  ;;  %v2567_v2 = vmul.u32.u64.low %v1297_v56, %v1292_v55  ;;  %v2568_v4 = vmul.u32.u64.high %v1297_v56, %v1292_v55, %v2567_v2  ;;  %vm2573_vm14 = vcmp.le.f32.partialorder %v1353_v53, 0.7853982  ;;  %v793_v55 = vpop.f32.mrf.mxu1 }
 0x17c   :  { %v1721_v1 = vadd.s32 4294967294, %v1421_v26  ;;  %v1296_v37 = vsel %vm1282_vm13, %v1293_v31, %v1295_v0  ;;  %v1564_v8 = vand.u32 2139095040, %v2556_v48  ;;  %vm1133_vm15 = vweird.f32 %v2218_v19 }
 0x17d   :  { %v2577_v51 = vmul.u32.u64.low %v1297_v56, %v1296_v37  ;;  %v2578_v28 = vmul.u32.u64.high %v1297_v56, %v1296_v37, %v2577_v51  ;;  %vm1136_vm0 = vcmp.lt.s32.totalorder %v2547_v41, 2  ;;  %vm1140_vm1 = vcmp.eq.s32.totalorder %v2547_v41, 2 }
 0x17e   :  { %vm1722_vm2 = vcmp.lt.s32.totalorder %v1721_v1, 0  ;;  %v1288_v43 = vsel %vm1282_vm13, %v1285_v24, %v1287_v58  ;;  %v1409_v53 = vadd.s32 %v2497_v11, %v2494_v38  ;;  %v1561_v39 = vand.u32 2147483647, %v2556_v48 }
 0x17f   :  { %v1424_v20 = vsel %vm1722_vm2, 0, %v1721_v1  ;;  %v1565_v12 = vshrl.u32 %v1564_v8, 23  ;;  %v1440_v9 = vsel %vm1355_vm9, %v1439_v36, %v2527_v10  ;;  %v1307_v23 = vadd.s32 1, %v2568_v4 }
 0x180   :  { %v1425_v46 = vsub.s32 32, %v1424_v20  ;;  %v1429_v14 = vsub.s32 4294967266, %v1424_v20  ;;  %v1426_v25 = vshll.u32 %v2543_v34, %v1424_v20  ;;  %v1304_v29 = vmul.u32 %v1297_v56, %v1288_v43 }
 0x181   :  { %v1923_v57 = vpop.eup %1922  ;;  %vm1306_vm3 = vc.u32 %v2578_v28, %v2567_v2  ;;  %v1727_v38 = vadd.s32 4294967169, %v1565_v12  ;;  %v1442_v10 = vsel %vm2573_vm14, 0, %v1440_v9  ;;  %vm1137_vm4 = vcmp.eq.s32.totalorder %v2547_v41, 0 }
 0x182   :  { %v1925_v11 = vpop.eup %1924  ;;  %v1141_v32 = vxor.u32 2147483648, %v1923_v57  ;;  %v1427_v17 = vshrl.u32 %v1409_v53, %v1425_v46  ;;  %v1430_v63 = vadd.s32 127, %v1429_v14  ;;  %v1308_v21 = vsel %vm1306_vm3, %v1307_v23, %v2568_v4 }
 0x183   :  { %v1138_v49 = vxor.u32 2147483648, %v1925_v11  ;;  %v1309_v13 = vadd.s32 %v1308_v21, %v1304_v29  ;;  %v1571_v22 = vadd.s32 1, %v1727_v38  ;;  %v680_v44 = vadd.f32 %v679_v61, %v2122_v54 }
 0x184   :  { %v1142_v34 = vsel %vm1140_vm1, %v1141_v32, %v1925_v11  ;;  %v1428_v5 = vor.u32 %v1427_v17, %v1426_v25  ;;  %v1431_v27 = vshll.u32 %v1430_v63, 23  ;;  %v1446_v33 = vadd.s32 3, %v1442_v10 }
 0x185   :  { %v1139_v7 = vsel %vm1137_vm4, %v1923_v57, %v1138_v49  ;;  %v1310_v3 = vadd.s32 536870912, %v1309_v13  ;;  %vm1572_vm5 = vcmp.gt.s32.totalorder %v1571_v22, 0  ;;  %v1568_v26 = vand.u32 8388607, %v1561_v39 }
 0x186   :  { %v1143_v30 = vsel %vm1136_vm0, %v1139_v7, %v1142_v34  ;;  %v1432_v60 = vor.u32 4788187, %v1431_v27  ;;  %v1573_v35 = vsel %vm1572_vm5, %v1571_v22, 0  ;;  %v1435_v58 = vcvt.s32.f32 %v1428_v5  ;;  %v1943_v34 = vld [vmem:[%s2742_s2] ss:$0 sm:$0xff]  ;;  %s1972_s2 = smov [#allocation2]  }
 0x187   :  { %v1144_v31 = vsel %vm1133_vm15, nan, %v1143_v30  ;;  %v2606_v62 = vshrl.u32 %v1310_v3, 30  ;;  %v1575_v36 = vand.u32 31, %v1573_v35  ;;  %v2611_v1 = vand.u32 3, %v1446_v33  ;;  %s1686_s12 = sshll.u32 %s1972_s2, 4  ;;  %s1687_s12 = int_to_ptr.vmem [resolvable:$true] %s1686_s12 }
 0x188   :  { %v1667_v56 = vmul.f32 0.5, %v1144_v31  ;;  %v1433_v24 = vand.u32 2147483647, %v1432_v60  ;;  %v1569_v19 = vor.u32 8388608, %v1568_v26  ;;  %v794_v51 = vadd.f32 %v793_v55, %v680_v44  ;;  %s1944_s13 = scalar_lea.vmem %s1687_s12, 1024  ;;  %p1949_p1 = scmp.lt.s32.totalorder %s1687_s12, %s1687_s12 }
 0x189   :  { %v1312_v54 = vshll.u32 %v2606_v62, 30  ;;  %v1576_v41 = vsub.s32 32, %v1575_v36  ;;  %v1578_v43 = vshll.u32 %v1966_v40, %v1575_v36  ;;  %v1581_v46 = vshll.u32 %v1967_v42, %v1575_v36  ;;  %p1945_p0 = scmp.ne.s32.totalorder %s1687_s12, %s1944_s13  ;;  %p1950_p2 = scmp.lt.s32.totalorder %s1944_s13, %s1944_s13 }
 0x18a   :  { %1675 = vst [vmem:[#allocation2 + $0x10] sm:$0xff] %v1667_v56  ;;  %v1436_v0 = vmul.f32 %v1435_v58, %v1433_v24  ;;  %v1584_v14 = vshll.u32 %v1968_v45, %v1575_v36  ;;  %v1574_v57 = vshrl.u32 %v1573_v35, 5  ;;  %v1587_v29 = vshll.u32 %v1969_v47, %v1575_v36 }
 0x18b   :  { %v2613_v37 = vsub.s32 %v1309_v13, %v1312_v54  ;;  %v1579_v4 = vshrl.u32 %v1967_v42, %v1576_v41  ;;  %v1582_v53 = vshrl.u32 %v1968_v45, %v1576_v41  ;;  %v1585_v20 = vshrl.u32 %v1969_v47, %v1576_v41  ;;  %p1951_p3 = por %p1950_p2, %p1949_p1 }
 0x18c   :  { %v1437_v8 = vxor.u32 2147483648, %v1436_v0  ;;  %v1588_v9 = vshrl.u32 %v1970_v50, %v1576_v41  ;;  %v1590_v21 = vshll.u32 %v1970_v50, %v1575_v36  ;;  %v1591_v61 = vshrl.u32 %v1971_v59, %v1576_v41 }
 0x18d   :  { %v1315_v12 = vsub.s32 0, %v2613_v37  ;;  %v1580_v25 = vor.u32 %v1579_v4, %v1578_v43  ;;  %v1583_v32 = vor.u32 %v1582_v53, %v1581_v46  ;;  %v1586_v17 = vor.u32 %v1585_v20, %v1584_v14  ;;  %p1952_p4 = pnand %p1951_p3, %p1945_p0 }
 0x18e   :  { %v1438_v23 = vsel %vm1355_vm9, %v1437_v8, %v1436_v0  ;;  %v1589_v63 = vor.u32 %v1588_v9, %v1587_v29  ;;  %v1305_v49 = vadd.s32 %v2567_v2, %v2578_v28  ;;  %v1609_v13 = vshll.u32 %v1569_v19, 8 }
 0x18f   :  { %v1441_v38 = vsel %vm2573_vm14, %v2359_v52, %v1438_v23  ;;  %v1716_v11 = vmin.u32 %v1315_v12, %v2613_v37  ;;  %v1577_v22 = vshrl.u32 %v1966_v40, %v1576_v41  ;;  %v1592_v16 = vor.u32 %v1591_v61, %v1590_v21 }
 0x190   :  { %1926 = vcosq.f32 %v1441_v38  ;;  %vm1593_vm6 = vcmp.lt.s32.totalorder %v1574_v57, 1  ;;  %v816_v5 = vmul.f32 %v1943_v34, %v794_v51  ;;  %vm1595_vm7 = vcmp.lt.s32.totalorder %v1574_v57, 3 }
 0x191   :  { %1928 = vsinq.f32 %v1441_v38  ;;  %v1317_v10 = vclz %v1716_v11  ;;  %vm1596_vm8 = vcmp.lt.s32.totalorder %v1574_v57, 4  ;;  %v1601_v7 = vsel %vm1593_vm6, %v1580_v25, %v1583_v32 }
 0x192   :  { %v1598_v3 = vsel %vm1596_vm8, %v1586_v17, 2102212464  ;;  %v1602_v44 = vsel %vm1596_vm8, %v1589_v63, 920167782  ;;  %v1605_v2 = vsel %vm1593_vm6, %v1583_v32, %v1586_v17  ;;  %v1606_v28 = vsel %vm1596_vm8, %v1592_v16, 1326507024 }
 0x193   :  { %v1717_v27 = vadd.s32 4294967294, %v1317_v10  ;;  %vm1594_vm10 = vcmp.lt.s32.totalorder %v1574_v57, 2  ;;  %v1603_v30 = vsel %vm1595_vm7, %v1586_v17, %v1602_v44  ;;  %v1607_v60 = vsel %vm1595_vm7, %v1589_v63, %v1606_v28 }
 0x194   :  { %v1604_v35 = vsel %vm1594_vm10, %v1601_v7, %v1603_v30  ;;  %v1608_v31 = vsel %vm1594_vm10, %v1605_v2, %v1607_v60  ;;  %v2645_v26 = vadd.f32 %v2553_v6, %v816_v5  ;;  %v1597_v24 = vsel %vm1593_vm6, %v1577_v22, %v1580_v25 }
 0x195   :  { %vm1718_vm9 = vcmp.lt.s32.totalorder %v1717_v27, 0  ;;  %v1599_v58 = vsel %vm1595_vm7, %v1583_v32, %v1598_v3  ;;  %v2649_v55 = vmul.u32.u64.low %v1609_v13, %v1608_v31  ;;  %v2650_v54 = vmul.u32.u64.high %v1609_v13, %v1608_v31, %v2649_v55 }
 0x196   :  { %v1320_v33 = vsel %vm1718_vm9, 0, %v1717_v27  ;;  %v2652_v41 = vmul.u32.u64.low %v1609_v13, %v1604_v35  ;;  %v2653_v0 = vmul.u32.u64.high %v1609_v13, %v1604_v35, %v2652_v41  ;;  %v1335_v6 = vsub.s32 4, %v2606_v62 }
 0x197   :  { %v1321_v36 = vsub.s32 32, %v1320_v33  ;;  %v1325_v56 = vsub.s32 4294967266, %v1320_v33  ;;  %v1322_v19 = vshll.u32 %v2613_v37, %v1320_v33  ;;  %v1600_v8 = vsel %vm1594_vm10, %v1597_v24, %v1599_v58 }
 0x198   :  { %v1460_v43 = vand.u32 2139095040, %v2645_v26  ;;  %vm1445_vm11 = vweird.f32 %v2359_v52  ;;  %vm1251_vm12 = vcmp.lt.s32.totalorder %v2442_v18, 0  ;;  %vm1618_vm13 = vc.u32 %v2650_v54, %v2652_v41 }
 0x199   :  { %v1323_v4 = vshrl.u32 %v1305_v49, %v1321_v36  ;;  %v1326_v51 = vadd.s32 127, %v1325_v56  ;;  %v1619_v12 = vadd.s32 1, %v2653_v0  ;;  %vm1452_vm14 = vcmp.eq.s32.totalorder %v2611_v1, 2 }
 0x19a   :  { %v1461_v37 = vshrl.u32 %v1460_v43, 23  ;;  %v1336_v9 = vsel %vm1251_vm12, %v1335_v6, %v2606_v62  ;;  %v1616_v23 = vmul.u32 %v1609_v13, %v1600_v8  ;;  %v1457_v38 = vand.u32 2147483647, %v2645_v26 }
 0x19b   :  { %v1324_v53 = vor.u32 %v1323_v4, %v1322_v19  ;;  %v1327_v20 = vshll.u32 %v1326_v51, 23  ;;  %v1620_v29 = vsel %vm1618_vm13, %v1619_v12, %v2653_v0  ;;  %vm1449_vm15 = vcmp.eq.s32.totalorder %v2611_v1, 0 }
 0x19c   :  { %v1723_v11 = vadd.s32 4294967169, %v1461_v37  ;;  %v1621_v21 = vadd.s32 %v1620_v29, %v1616_v23  ;;  %vm2674_vm0 = vcmp.le.f32.partialorder %v1249_v15, 0.7853982  ;;  %vm1448_vm1 = vcmp.lt.s32.totalorder %v2611_v1, 2 }
 0x19d   :  { %v1927_v46 = vpop.eup %1926  ;;  %v1328_v14 = vor.u32 4788187, %v1327_v20  ;;  %v1331_v63 = vcvt.s32.f32 %v1324_v53  ;;  %v1338_v34 = vsel %vm2674_vm0, 0, %v1336_v9  ;;  %v1464_v5 = vand.u32 8388607, %v1457_v38 }
 0x19e   :  { %v1929_v57 = vpop.eup %1928  ;;  %v1453_v25 = vxor.u32 2147483648, %v1927_v46  ;;  %v1467_v62 = vadd.s32 1, %v1723_v11  ;;  %v1622_v22 = vadd.s32 536870912, %v1621_v21  ;;  %v1342_v60 = vadd.s32 3, %v1338_v34 }
 0x19f   :  { %v1450_v32 = vxor.u32 2147483648, %v1929_v57  ;;  %v1329_v17 = vand.u32 2147483647, %v1328_v14  ;;  %v1465_v35 = vor.u32 8388608, %v1464_v5  ;;  %vm1563_vm13 = vcmp.lt.s32.totalorder %v2556_v48, 0 }
 0x1a0   :  { %v1454_v61 = vsel %vm1452_vm14, %v1453_v25, %v1929_v57  ;;  %vm1468_vm2 = vcmp.gt.s32.totalorder %v1467_v62, 0  ;;  %v2685_v7 = vshrl.u32 %v1622_v22, 30  ;;  %v1343_v20 = vand.u32 3, %v1342_v60 }
 0x1a1   :  { %v1451_v10 = vsel %vm1449_vm15, %v1927_v46, %v1450_v32  ;;  %v1332_v13 = vmul.f32 %v1331_v63, %v1329_v17  ;;  %v1469_v3 = vsel %vm1468_vm2, %v1467_v62, 0  ;;  %v1505_v14 = vshll.u32 %v1465_v35, 8 }
 0x1a2   :  { %v1455_v16 = vsel %vm1448_vm1, %v1451_v10, %v1454_v61  ;;  %v1471_v1 = vand.u32 31, %v1469_v3  ;;  %v1624_v28 = vshll.u32 %v2685_v7, 30  ;;  %v1470_v31 = vshrl.u32 %v1469_v3, 5 }
 0x1a3   :  { %v1456_v15 = vsel %vm1445_vm11, nan, %v1455_v16  ;;  %v1333_v27 = vxor.u32 2147483648, %v1332_v13  ;;  %v1617_v62 = vadd.s32 %v2652_v41, %v2650_v54  ;;  %vm1348_vm8 = vcmp.eq.s32.totalorder %v1343_v20, 2 }
 0x1a4   :  { %v1670_v44 = vmul.f32 0.5, %v1456_v15  ;;  %v1472_v33 = vsub.s32 32, %v1471_v1  ;;  %v2693_v52 = vsub.s32 %v1621_v21, %v1624_v28  ;;  %v1474_v36 = vshll.u32 %v1966_v40, %v1471_v1 }
 0x1a5   :  { %v1334_v2 = vsel %vm1251_vm12, %v1333_v27, %v1332_v13  ;;  %v1477_v24 = vshll.u32 %v1967_v42, %v1471_v1  ;;  %v1480_v0 = vshll.u32 %v1968_v45, %v1471_v1  ;;  %v1483_v4 = vshll.u32 %v1969_v47, %v1471_v1 }
 0x1a6   :  { %1678 = vst [vmem:[#allocation2 + $0x28] sm:$0xff] %v1670_v44  ;;  %v1337_v30 = vsel %vm2674_vm0, %v2442_v18, %v1334_v2  ;;  %v1475_v56 = vshrl.u32 %v1967_v42, %v1472_v33  ;;  %v1627_v58 = vsub.s32 0, %v2693_v52  ;;  %v1478_v55 = vshrl.u32 %v1968_v45, %v1472_v33 }
 0x1a7   :  { %1930 = vcosq.f32 %v1337_v30  ;;  %v1481_v19 = vshrl.u32 %v1969_v47, %v1472_v33  ;;  %v1484_v51 = vshrl.u32 %v1970_v50, %v1472_v33  ;;  %v1486_v42 = vshll.u32 %v1970_v50, %v1471_v1 }
 0x1a8   :  { %1932 = vsinq.f32 %v1337_v30  ;;  %v1728_v6 = vmin.u32 %v1627_v58, %v2693_v52  ;;  %v1476_v8 = vor.u32 %v1475_v56, %v1474_v36  ;;  %v1479_v43 = vor.u32 %v1478_v55, %v1477_v24 }
 0x1a9   :  { %v1482_v53 = vor.u32 %v1481_v19, %v1480_v0  ;;  %v1485_v12 = vor.u32 %v1484_v51, %v1483_v4  ;;  %v1487_v37 = vshrl.u32 %v1971_v59, %v1472_v33  ;;  %v1473_v45 = vshrl.u32 %v1966_v40, %v1472_v33 }
 0x1aa   :  { %v1629_v46 = vclz %v1728_v6  ;;  %vm1489_vm3 = vcmp.lt.s32.totalorder %v1470_v31, 1  ;;  %vm1490_vm4 = vcmp.lt.s32.totalorder %v1470_v31, 2  ;;  %vm1491_vm5 = vcmp.lt.s32.totalorder %v1470_v31, 3 }
 0x1ab   :  { %v1488_v9 = vor.u32 %v1487_v37, %v1486_v42  ;;  %vm1492_vm6 = vcmp.lt.s32.totalorder %v1470_v31, 4  ;;  %v1497_v57 = vsel %vm1489_vm3, %v1476_v8, %v1479_v43  ;;  %v1493_v29 = vsel %vm1489_vm3, %v1473_v45, %v1476_v8 }
 0x1ac   :  { %v1729_v47 = vadd.s32 4294967294, %v1629_v46  ;;  %v1494_v23 = vsel %vm1492_vm6, %v1482_v53, 2102212464  ;;  %v1498_v25 = vsel %vm1492_vm6, %v1485_v12, 920167782  ;;  %v1501_v32 = vsel %vm1489_vm3, %v1479_v43, %v1482_v53 }
 0x1ad   :  { %v1499_v11 = vsel %vm1491_vm5, %v1482_v53, %v1498_v25  ;;  %v1502_v17 = vsel %vm1492_vm6, %v1488_v9, 1326507024  ;;  %v1495_v50 = vsel %vm1491_vm5, %v1479_v43, %v1494_v23  ;;  %vm1345_vm9 = vcmp.eq.s32.totalorder %v1343_v20, 0 }
 0x1ae   :  { %vm1730_vm7 = vcmp.lt.s32.totalorder %v1729_v47, 0  ;;  %v1500_v59 = vsel %vm1490_vm4, %v1497_v57, %v1499_v11  ;;  %v1503_v63 = vsel %vm1491_vm5, %v1485_v12, %v1502_v17  ;;  %v1496_v16 = vsel %vm1490_vm4, %v1493_v29, %v1495_v50 }
 0x1af   :  { %v1632_v40 = vsel %vm1730_vm7, 0, %v1729_v47  ;;  %v1504_v21 = vsel %vm1490_vm4, %v1501_v32, %v1503_v63  ;;  %v2710_v61 = vmul.u32.u64.low %v1505_v14, %v1500_v59  ;;  %v2711_v49 = vmul.u32.u64.high %v1505_v14, %v1500_v59, %v2710_v61 }
 0x1b0   :  { %v1633_v10 = vsub.s32 32, %v1632_v40  ;;  %v1637_v13 = vsub.s32 4294967266, %v1632_v40  ;;  %v2716_v34 = vmul.u32.u64.low %v1505_v14, %v1504_v21  ;;  %v2717_v5 = vmul.u32.u64.high %v1505_v14, %v1504_v21, %v2716_v34 }
 0x1b1   :  { %v1634_v3 = vshll.u32 %v2693_v52, %v1632_v40  ;;  %v1515_v28 = vadd.s32 1, %v2711_v49  ;;  %vm1344_vm10 = vcmp.lt.s32.totalorder %v1343_v20, 2  ;;  %v1512_v33 = vmul.u32 %v1505_v14, %v1496_v16 }
 0x1b2   :  { %v1635_v44 = vshrl.u32 %v1617_v62, %v1633_v10  ;;  %v1638_v1 = vadd.s32 127, %v1637_v13  ;;  %vm1514_vm11 = vc.u32 %v2717_v5, %v2710_v61  ;;  %vm1341_vm12 = vweird.f32 %v2442_v18 }
 0x1b3   :  { %v1516_v52 = vsel %vm1514_vm11, %v1515_v28, %v2711_v49  ;;  %v1647_v6 = vsub.s32 4, %v2685_v7  ;;  %vm1562_vm14 = vcmp.le.f32.partialorder %v1561_v39, 0.7853982  ;;  %v1513_v23 = vadd.s32 %v2710_v61, %v2717_v5 }
 0x1b4   :  { %v1931_v22 = vpop.eup %1930  ;;  %v1636_v41 = vor.u32 %v1635_v44, %v1634_v3  ;;  %v1639_v30 = vshll.u32 %v1638_v1, 23  ;;  %v1517_v56 = vadd.s32 %v1516_v52, %v1512_v33  ;;  %vm1653_vm3 = vweird.f32 %v2556_v48 }
 0x1b5   :  { %v1933_v15 = vpop.eup %1932  ;;  %v1349_v27 = vxor.u32 2147483648, %v1931_v22  ;;  %v1648_v20 = vsel %vm1563_vm13, %v1647_v6, %v2685_v7  ;;  %vm1459_vm4 = vcmp.lt.s32.totalorder %v2645_v26, 0  ;;  %vm1458_vm5 = vcmp.le.f32.partialorder %v1457_v38, 0.7853982 }
 0x1b6   :  { %v1346_v2 = vxor.u32 2147483648, %v1933_v15  ;;  %v1640_v31 = vor.u32 4788187, %v1639_v30  ;;  %v1643_v55 = vcvt.s32.f32 %v1636_v41  ;;  %v1518_v0 = vadd.s32 536870912, %v1517_v56 }
 0x1b7   :  { %v1350_v54 = vsel %vm1348_vm8, %v1349_v27, %v1933_v15  ;;  %v1650_v37 = vsel %vm1562_vm14, 0, %v1648_v20 }
 0x1b8   :  { %v1347_v60 = vsel %vm1345_vm9, %v1931_v22, %v1346_v2  ;;  %v1641_v58 = vand.u32 2147483647, %v1640_v31  ;;  %v1519_v4 = vshrl.u32 %v1518_v0, 30  ;;  %v1654_v45 = vadd.s32 3, %v1650_v37 }
 0x1b9   :  { %v1351_v35 = vsel %vm1344_vm10, %v1347_v60, %v1350_v54  ;;  %vm1549_vm9 = vweird.f32 %v2645_v26 }
 0x1ba   :  { %v1352_v36 = vsel %vm1341_vm12, nan, %v1351_v35  ;;  %v1644_v19 = vmul.f32 %v1643_v55, %v1641_v58  ;;  %v1520_v8 = vshll.u32 %v1519_v4, 30  ;;  %v1655_v47 = vand.u32 3, %v1654_v45 }
 0x1bb   :  { %v1669_v24 = vmul.f32 0.5, %v1352_v36  ;;  %v1543_v5 = vsub.s32 4, %v1519_v4 }
 0x1bc   :  { %v1645_v51 = vxor.u32 2147483648, %v1644_v19  ;;  %v1521_v53 = vsub.s32 %v1517_v56, %v1520_v8  ;;  %vm1660_vm0 = vcmp.eq.s32.totalorder %v1655_v47, 2  ;;  %vm1657_vm1 = vcmp.eq.s32.totalorder %v1655_v47, 0 }
 0x1bd   :  { %1677 = vst [vmem:[#allocation2 + $0x20] sm:$0xff] %v1669_v24  ;;  %vm1656_vm2 = vcmp.lt.s32.totalorder %v1655_v47, 2  ;;  %v1544_v3 = vsel %vm1459_vm4, %v1543_v5, %v1519_v4 }
 0x1be   :  { %v1646_v18 = vsel %vm1563_vm13, %v1645_v51, %v1644_v19  ;;  %v1523_v12 = vsub.s32 0, %v1521_v53 }
 0x1bf   :  { %v1649_v43 = vsel %vm1562_vm14, %v2556_v48, %v1646_v18  ;;  %v1546_v48 = vsel %vm1458_vm5, 0, %v1544_v3 }
 0x1c0   :  { %1934 = vcosq.f32 %v1649_v43  ;;  %v1724_v42 = vmin.u32 %v1523_v12, %v1521_v53  ;;  %v1550_v44 = vadd.s32 3, %v1546_v48 }
 0x1c1   :  { %1936 = vsinq.f32 %v1649_v43 }
 0x1c2   :  { %v1525_v46 = vclz %v1724_v42  ;;  %v1551_v1 = vand.u32 3, %v1550_v44 }
 0x1c4   :  { %v1725_v14 = vadd.s32 4294967294, %v1525_v46  ;;  %vm1556_vm6 = vcmp.eq.s32.totalorder %v1551_v1, 2  ;;  %vm1553_vm7 = vcmp.eq.s32.totalorder %v1551_v1, 0  ;;  %vm1552_vm8 = vcmp.lt.s32.totalorder %v1551_v1, 2 }
 0x1c6   :  { %vm1726_vm15 = vcmp.lt.s32.totalorder %v1725_v14, 0 }
 0x1c7   :  { %v1528_v9 = vsel %vm1726_vm15, 0, %v1725_v14 }
 0x1c8   :  { %v1529_v39 = vsub.s32 32, %v1528_v9  ;;  %v1533_v57 = vsub.s32 4294967266, %v1528_v9  ;;  %v1530_v29 = vshll.u32 %v1521_v53, %v1528_v9 }
 0x1ca   :  { %v1531_v11 = vshrl.u32 %v1513_v23, %v1529_v39  ;;  %v1534_v32 = vadd.s32 127, %v1533_v57 }
 0x1cc   :  { %v1532_v59 = vor.u32 %v1531_v11, %v1530_v29  ;;  %v1535_v63 = vshll.u32 %v1534_v32, 23 }
 0x1cd   :  { %v1935_v25 = vpop.eup %1934 }
 0x1ce   :  { %v1937_v17 = vpop.eup %1936  ;;  %v1661_v7 = vxor.u32 2147483648, %v1935_v25  ;;  %v1536_v49 = vor.u32 4788187, %v1535_v63  ;;  %v1539_v13 = vcvt.s32.f32 %v1532_v59 }
 0x1cf   :  { %v1658_v50 = vxor.u32 2147483648, %v1937_v17 }
 0x1d0   :  { %v1662_v40 = vsel %vm1660_vm0, %v1661_v7, %v1937_v17  ;;  %v1537_v10 = vand.u32 2147483647, %v1536_v49 }
 0x1d1   :  { %v1659_v21 = vsel %vm1657_vm1, %v1935_v25, %v1658_v50 }
 0x1d2   :  { %v1663_v61 = vsel %vm1656_vm2, %v1659_v21, %v1662_v40  ;;  %v1540_v16 = vmul.f32 %v1539_v13, %v1537_v10 }
 0x1d3   :  { %v1664_v62 = vsel %vm1653_vm3, nan, %v1663_v61 }
 0x1d4   :  { %v1672_v22 = vmul.f32 0.5, %v1664_v62  ;;  %v1541_v34 = vxor.u32 2147483648, %v1540_v16 }
 0x1d6   :  { %1680 = vst [vmem:[#allocation2 + $0x38] sm:$0xff] %v1672_v22  ;;  %v1542_v15 = vsel %vm1459_vm4, %v1541_v34, %v1540_v16 }
 0x1d7   :  { %v1545_v27 = vsel %vm1458_vm5, %v2645_v26, %v1542_v15 }
 0x1d8   :  { %1938 = vcosq.f32 %v1545_v27 }
 0x1d9   :  { %1940 = vsinq.f32 %v1545_v27 }
 0x1e5   :  { %v1939_v2 = vpop.eup %1938 }
 0x1e6   :  { %v1941_v28 = vpop.eup %1940  ;;  %v1557_v54 = vxor.u32 2147483648, %v1939_v2 }
 0x1e7   :  { %v1554_v41 = vxor.u32 2147483648, %v1941_v28 }
 0x1e8   :  { %v1558_v30 = vsel %vm1556_vm6, %v1557_v54, %v1941_v28 }
 0x1e9   :  { %v1555_v60 = vsel %vm1553_vm7, %v1939_v2, %v1554_v41 }
 0x1ea   :  { %v1559_v38 = vsel %vm1552_vm8, %v1555_v60, %v1558_v30 }
 0x1eb   :  { %v1560_v33 = vsel %vm1549_vm9, nan, %v1559_v38 }
 0x1ec   :  { %v1671_v35 = vmul.f32 0.5, %v1560_v33 }
 0x1ee   :  { %1679 = vst [vmem:[#allocation2 + $0x30] sm:$0xff] %v1671_v35 }
 0x1ef   :  { %1955 = shalt.err (!%p1952_p4)
}
 0x1f0   :  { %s1973_s14 = smov 128   ;;  %s1974_s15 = smov 8  }
 0x1f1   :  { %1692 = dma.vmem_to_hbm [thread:$0]  %s1687_s12, 1024, %s2744_s4, [#allocation3], %s1973_s14, %s1973_s14, %s1974_s15  }
 0x1f2   :  { %1964 = dma.done.wait [#allocation3], 1024  }
 0x1f3   :  { %1965 = vsyncadd [#allocation3], 4294966272 }
 0x1f4   :  { %1696 = vsyncpa [#allocation3], 1 }

</bundles_post_ra>
